<compile_context>
chip_gen: v5e
topology: v5e:2x2
jax: 0.10.0
libtpu: 0.0.40
codegen_flags: <defaults>
</compile_context>

<pallas_src>
import functools
import math

import jax
import jax.numpy as jnp
from jax.experimental import pallas as pl
from jax.experimental.pallas import tpu as pltpu

_LN_EPS = 1e-5                     # torch nn.LayerNorm default


@functools.lru_cache(maxsize=None)
def _vmem_limit_bytes():
    # generation-aware scoped-VMEM limit: ~48 MiB on v7x (64 MiB physical),
    # ~96 MiB on v5e/v6e (128 MiB physical).
    cap = 128 * 1024 * 1024
    try:
        cap = int(getattr(pltpu.get_tpu_info(), "vmem_capacity_bytes", cap))
    except Exception:
        pass
    return int(min(max(cap * 3 // 4, 32 * 1024 * 1024), 100 * 1024 * 1024))


def _round_up(x, m):
    return (x + m - 1) // m * m


def _token_tile(n):
    # largest 8..512-row tile dividing N: big tiles amortize the ~0.35us
    # per-grid-step overhead and keep the MXU fed; tiny demos use one block.
    for t in (512, 256, 128, 64, 32, 16, 8):
        if n % t == 0:
            return t
    return n


def _moe_tile(n_tokens, n_experts):
    # per-expert row tile: >=128 rows at real token counts (MXU / DMA
    # efficiency), shrunk proportionally for tiny demo shapes; multiple of 16
    # so bf16 sublane packing stays aligned.
    return int(min(512, max(16, _round_up(n_tokens // max(n_experts, 1), 16))))


def _layer_norm(z, gamma, beta, eps):
    # f32 statistics (biased variance, like torch)
    mean = jnp.mean(z, axis=-1, keepdims=True)
    var = jnp.mean(jnp.square(z - mean), axis=-1, keepdims=True)
    return (z - mean) * jax.lax.rsqrt(var + eps) * gamma + beta


# ----------------------------------------------------------------------------
# Fused multi-head attention + residual + LayerNorm.
# grid = (batch, head); per-head weight slices come in via BlockSpec, the
# output projection is accumulated over heads in an f32 VMEM scratch and the
# residual + LayerNorm epilogue runs on the last head.
# ----------------------------------------------------------------------------
def _mha_ln_kernel(x_ref, kv_ref, m_ref,
                   wq_ref, bq_ref, wk_ref, bk_ref, wv_ref, bv_ref,
                   wo_ref, bo_ref, g_ref, bt_ref,
                   o_ref, acc_ref, *, inv_scale, eps):
    h = pl.program_id(1)

    @pl.when(h == 0)
    def _():
        acc_ref[...] = jnp.zeros_like(acc_ref)

    x = x_ref[0]                                     # (Sq, D) bf16 (also residual)
    kv = kv_ref[0]                                   # (Sk, D) bf16

    # per-head projections, f32 MXU accumulation; 1/sqrt(head_dim) folded into Q
    q = (jnp.dot(x, wq_ref[0], preferred_element_type=jnp.float32)
         + bq_ref[0]) * inv_scale                    # (Sq, hd) f32
    k = jnp.dot(kv, wk_ref[0], preferred_element_type=jnp.float32) + bk_ref[0]
    v = jnp.dot(kv, wv_ref[0], preferred_element_type=jnp.float32) + bv_ref[0]

    # scores for this head (Q @ K^T), f32 softmax statistics
    energy = jax.lax.dot_general(
        q.astype(jnp.bfloat16), k.astype(jnp.bfloat16),
        dimension_numbers=(((1,), (1,)), ((), ())),
        preferred_element_type=jnp.float32)          # (Sq, Sk)
    # (dropout on energy is identity in eval mode)
    energy = jnp.where(m_ref[0] == 0.0, -1e10, energy)   # masked_fill(mask==0, -1e10)
    attn = jax.nn.softmax(energy, axis=-1)
    ctx = jnp.dot(attn.astype(jnp.bfloat16), v.astype(jnp.bfloat16),
                  preferred_element_type=jnp.float32)     # (Sq, hd)

    # accumulate this head's slice of the output projection
    acc_ref[...] += jnp.dot(ctx.astype(jnp.bfloat16), wo_ref[0],
                            preferred_element_type=jnp.float32)   # (Sq, D)

    @pl.when(h == pl.num_programs(1) - 1)
    def _():
        out = acc_ref[...] + bo_ref[...].astype(jnp.float32)
        z = x.astype(jnp.float32) + out              # residual (dropout = identity)
        o_ref[0] = _layer_norm(z, g_ref[...], bt_ref[...], eps).astype(o_ref.dtype)


def mha_add_ln(q, kv, mask, p, ln, n_heads):
    B, Sq, D = q.shape
    Sk = kv.shape[1]
    mq = mask.shape[1]
    hd = D // n_heads
    kernel = functools.partial(_mha_ln_kernel,
                               inv_scale=1.0 / math.sqrt(hd), eps=_LN_EPS)
    bh_b = lambda b, h: (b, 0, 0)      # per-batch activation blocks (resident over h)
    bh_h = lambda b, h: (h, 0, 0)      # per-head weight blocks
    bh_c = lambda b, h: (0, 0)         # broadcast / resident blocks

    flops = int(B * (2 * Sq * D * D + 4 * Sk * D * D + 4 * Sq * Sk * D
                     + 2 * Sq * D * D))
    bytes_accessed = int(2 * (2 * B * Sq * D + B * Sk * D + 4 * D * D + 4 * D)
                         + 4 * (B * mq * Sk + 2 * D))
    # TODO(synk): add a query-tile grid axis + online softmax for long sequences.
    return pl.pallas_call(
        kernel,
        out_shape=jax.ShapeDtypeStruct((B, Sq, D), jnp.bfloat16),
        grid=(B, n_heads),
        in_specs=[
            pl.BlockSpec((1, Sq, D), bh_b),
            pl.BlockSpec((1, Sk, D), bh_b),
            pl.BlockSpec((1, mq, Sk), bh_b),
            pl.BlockSpec((1, D, hd), bh_h), pl.BlockSpec((1, 1, hd), bh_h),   # Wq, bq
            pl.BlockSpec((1, D, hd), bh_h), pl.BlockSpec((1, 1, hd), bh_h),   # Wk, bk
            pl.BlockSpec((1, D, hd), bh_h), pl.BlockSpec((1, 1, hd), bh_h),   # Wv, bv
            pl.BlockSpec((1, hd, D), bh_h),                                   # Wo slice
            pl.BlockSpec((1, D), bh_c),                                       # bo
            pl.BlockSpec((1, D), bh_c), pl.BlockSpec((1, D), bh_c),           # gamma, beta
        ],
        out_specs=pl.BlockSpec((1, Sq, D), bh_b),
        scratch_shapes=[pltpu.VMEM((Sq, D), jnp.float32)],
        compiler_params=pltpu.CompilerParams(
            dimension_semantics=("parallel", "arbitrary"),
            vmem_limit_bytes=_vmem_limit_bytes()),
        cost_estimate=pl.CostEstimate(flops=flops,
                                      transcendentals=int(B * n_heads * Sq * Sk),
                                      bytes_accessed=bytes_accessed),
    )(q, kv, mask, p["wq"], p["bq"], p["wk"], p["bk"], p["wv"], p["bv"],
      p["wo"], p["bo"], ln["gamma"], ln["beta"])


# ----------------------------------------------------------------------------
# Fused FeedForward + residual + LayerNorm (dense, n_experts == 1 path)
# ----------------------------------------------------------------------------
def _ffn_ln_kernel(x_ref, w1_ref, b1_ref, w2_ref, b2_ref, g_ref, bt_ref, o_ref,
                   *, eps):
    x = x_ref[...]                                     # (Tn, D) bf16: input == residual
    h = jnp.dot(x, w1_ref[...], preferred_element_type=jnp.float32) + b1_ref[...]
    h = jnp.maximum(h, 0.0).astype(jnp.bfloat16)       # relu (dropout: identity)
    y = jnp.dot(h, w2_ref[...], preferred_element_type=jnp.float32) + b2_ref[...]
    o_ref[...] = _layer_norm(x.astype(jnp.float32) + y,
                             g_ref[...], bt_ref[...], eps).astype(o_ref.dtype)


def ffn_add_ln(x2d, p, ln):
    N, D = x2d.shape
    F = p["w1"].shape[1]
    tile = _token_tile(N)
    const = lambda i: (0, 0)
    flops = int(4 * N * D * F)
    bytes_accessed = int(2 * (2 * N * D + 2 * D * F + F + D) + 4 * 2 * D)
    # TODO(synk): add a K-reduction grid axis over F with an f32 accumulator
    # when D*F weights exceed the VMEM budget (not needed at demo sizes).
    return pl.pallas_call(
        functools.partial(_ffn_ln_kernel, eps=_LN_EPS),
        out_shape=jax.ShapeDtypeStruct((N, D), jnp.bfloat16),
        grid=(pl.cdiv(N, tile),),
        in_specs=[
            pl.BlockSpec((tile, D), lambda i: (i, 0)),
            # weights/biases stay resident (constant index_map)
            pl.BlockSpec((D, F), const), pl.BlockSpec((1, F), const),
            pl.BlockSpec((F, D), const), pl.BlockSpec((1, D), const),
            pl.BlockSpec((1, D), const), pl.BlockSpec((1, D), const),
        ],
        out_specs=pl.BlockSpec((tile, D), lambda i: (i, 0)),
        compiler_params=pltpu.CompilerParams(
            dimension_semantics=("parallel",), vmem_limit_bytes=_vmem_limit_bytes()),
        cost_estimate=pl.CostEstimate(flops=flops, transcendentals=0,
                                      bytes_accessed=bytes_accessed),
    )(x2d, p["w1"], p["b1"], p["w2"], p["b2"], ln["gamma"], ln["beta"])


# ----------------------------------------------------------------------------
# Switch router: softmax(x @ Ws + bs) -> routes, and x * route_prob_max
# (the probability scaling is folded into the kernel that already reads x;
# the reference scales the expert INPUT, which this matches).
# ----------------------------------------------------------------------------
def _router_kernel(x_ref, ws_ref, bs_ref, xs_ref, routes_ref):
    x = x_ref[...].astype(jnp.float32)                  # (Tn, D)
    logits = jnp.dot(x_ref[...], ws_ref[...],
                     preferred_element_type=jnp.float32) + bs_ref[...]
    prob = jax.nn.softmax(logits, axis=-1)              # (Tn, E) f32
    pmax = jnp.max(prob, axis=-1, keepdims=True)        # (Tn, 1)
    idx = jax.lax.broadcasted_iota(jnp.int32, prob.shape, 1)
    routes = jnp.min(jnp.where(prob == pmax, idx, jnp.int32(2 ** 30)),
                     axis=-1, keepdims=True)            # first argmax (torch tie-break)
    xs_ref[...] = (x * pmax).astype(xs_ref.dtype)       # x * route_prob_max
    routes_ref[...] = routes                            # narrow int32 handoff (tiny)


def router_scale(x2d, ws, bs):
    N, D = x2d.shape
    E = ws.shape[1]
    tile = _token_tile(N)
    const = lambda i: (0, 0)
    return pl.pallas_call(
        _router_kernel,
        out_shape=(jax.ShapeDtypeStruct((N, D), jnp.bfloat16),
                   jax.ShapeDtypeStruct((N, 1), jnp.int32)),
        grid=(pl.cdiv(N, tile),),
        in_specs=[pl.BlockSpec((tile, D), lambda i: (i, 0)),
                  pl.BlockSpec((D, E), const), pl.BlockSpec((1, E), const)],
        out_specs=(pl.BlockSpec((tile, D), lambda i: (i, 0)),
                   pl.BlockSpec((tile, 1), lambda i: (i, 0))),
        compiler_params=pltpu.CompilerParams(
            dimension_semantics=("parallel",), vmem_limit_bytes=_vmem_limit_bytes()),
    )(x2d, ws, bs)


# ----------------------------------------------------------------------------
# Grouped expert FFN with fused residual-add + LayerNorm epilogue.
# One pallas_call over tile-aligned, expert-grouped tokens; the per-tile expert
# id and real-row count are scalar-prefetched (the id drives the weight
# index_map, the count gates all-padding tiles with pl.when).
# ----------------------------------------------------------------------------
def _grouped_ffn_ln_kernel(eid_ref, valid_ref, x_ref, r_ref,
                           w1_ref, b1_ref, w2_ref, b2_ref, g_ref, bt_ref,
                           o_ref, *, eps):
    del eid_ref                                         # consumed by the index_maps
    t = pl.program_id(0)

    @pl.when(valid_ref[t] > 0)                          # skip all-padding tiles
    def _():
        x = x_ref[...]                                  # (Tn, D) one expert's tokens
        h = jnp.dot(x, w1_ref[0], preferred_element_type=jnp.float32) + b1_ref[0]
        h = jnp.maximum(h, 0.0).astype(jnp.bfloat16)
        y = jnp.dot(h, w2_ref[0], preferred_element_type=jnp.float32) + b2_ref[0]
        z = r_ref[...].astype(jnp.float32) + y          # fused residual add
        o_ref[...] = _layer_norm(z, g_ref[...], bt_ref[...], eps).astype(o_ref.dtype)


def grouped_expert_ffn_ln(tile_eid, tile_valid, x_pad, r_pad, p, ln, tile):
    n_pad, D = x_pad.shape
    E, _, F = p["w1"].shape
    n_tiles = n_pad // tile
    x_map = lambda t, eid, val: (t, 0)
    w_map = lambda t, eid, val: (eid[t], 0, 0)
    c_map = lambda t, eid, val: (0, 0)
    grid_spec = pltpu.PrefetchScalarGridSpec(
        num_scalar_prefetch=2,
        grid=(n_tiles,),
        in_specs=[
            pl.BlockSpec((tile, D), x_map),             # expert inputs (scaled x)
            pl.BlockSpec((tile, D), x_map),             # residual rows (same layout)
            pl.BlockSpec((1, D, F), w_map), pl.BlockSpec((1, 1, F), w_map),
            pl.BlockSpec((1, F, D), w_map), pl.BlockSpec((1, 1, D), w_map),
            pl.BlockSpec((1, D), c_map), pl.BlockSpec((1, D), c_map),
        ],
        out_specs=pl.BlockSpec((tile, D), x_map),
    )
    flops = int(4 * n_pad * D * F)
    bytes_accessed = int(2 * (3 * n_pad * D + 2 * E * D * F) + 4 * 2 * D)
    return pl.pallas_call(
        functools.partial(_grouped_ffn_ln_kernel, eps=_LN_EPS),
        out_shape=jax.ShapeDtypeStruct((n_pad, D), jnp.bfloat16),
        grid_spec=grid_spec,
        compiler_params=pltpu.CompilerParams(
            dimension_semantics=("arbitrary",), vmem_limit_bytes=_vmem_limit_bytes()),
        cost_estimate=pl.CostEstimate(flops=flops, transcendentals=0,
                                      bytes_accessed=bytes_accessed),
    )(tile_eid, tile_valid, x_pad, r_pad, p["w1"], p["b1"], p["w2"], p["b2"],
      ln["gamma"], ln["beta"])


def switch_ffn_add_ln(x, p, ln, n_experts):
    B, S, D = x.shape
    N = B * S
    x_flat = x.reshape(N, D)

    # router: logits -> softmax -> argmax, with route_prob_max scaling fused in
    x_scaled, routes = router_scale(x_flat, p["ws"], p["bs"])
    routes = routes[:, 0]

    tile = _moe_tile(N, n_experts)
    # group tokens by expert (stable order inside a group) on the JAX side.
    # TODO(synk): data-dependent token sort/scatter stays as XLA glue (gather).
    perm = jnp.argsort(routes, stable=True)
    sorted_eid = routes[perm]
    counts = jnp.bincount(routes, length=n_experts).astype(jnp.int32)
    group_starts = jnp.concatenate([jnp.zeros((1,), jnp.int32),
                                    jnp.cumsum(counts)[:-1]])
    padded_counts = ((counts + tile - 1) // tile) * tile
    padded_starts = jnp.concatenate([jnp.zeros((1,), jnp.int32),
                                     jnp.cumsum(padded_counts)[:-1]])
    rank = jnp.arange(N, dtype=jnp.int32) - group_starts[sorted_eid]
    dest = padded_starts[sorted_eid] + rank              # sorted idx -> padded row

    n_tiles = int(pl.cdiv(N, tile)) + n_experts          # static upper bound on tiles
    n_pad = n_tiles * tile
    x_pad = jnp.zeros((n_pad, D), jnp.bfloat16).at[dest].set(x_scaled[perm])
    # residual rows scattered into the same padded slots as their output rows
    # (reference: norm_3(trg + cat(expert_outputs)) in expert-grouped order)
    r_pad = jnp.zeros((n_pad, D), jnp.bfloat16).at[dest].set(x_flat)

    # per-tile expert id + number of real (non-padding) rows (scalar prefetch)
    tile_start = jnp.arange(n_tiles, dtype=jnp.int32) * tile
    group_end = padded_starts + padded_counts
    tile_eid = jnp.sum(tile_start[:, None] >= group_end[None, :], axis=1)
    tile_eid = jnp.minimum(tile_eid, n_experts - 1).astype(jnp.int32)
    tile_valid = jnp.clip(counts[tile_eid] - (tile_start - padded_starts[tile_eid]),
                          0, tile).astype(jnp.int32)

    out_pad = grouped_expert_ffn_ln(tile_eid, tile_valid, x_pad, r_pad, p, ln, tile)
    # reference semantics: torch.cat(route_outputs, dim=0) keeps expert-grouped order
    return out_pad[dest].reshape(B, S, D)


# ----------------------------------------------------------------------------
# DecoderLayer forward
# ----------------------------------------------------------------------------
def prep_mask(mask):
    # torch-style (B, 1, mq, Sk) mask -> compact (B, mq, Sk) float32; the MHA
    # kernel broadcasts it in-register (no (B,Sq,Sk) HBM materialization).
    B, _, mq, Sk = mask.shape
    return mask.reshape(B, mq, Sk).astype(jnp.float32)


def decoder_layer(params, trg, enc_out, trg_mask, src_mask, *, n_heads, n_experts):
    B, S, D = trg.shape
    trg = trg.astype(jnp.bfloat16)
    enc_out = enc_out.astype(jnp.bfloat16)
    # sub-layer 1: self-attention + residual + LayerNorm (single fused kernel)
    trg = mha_add_ln(trg, trg, prep_mask(trg_mask), params["mha1"],
                     params["ln1"], n_heads)
    # sub-layer 2: cross-attention + residual + LayerNorm (single fused kernel)
    trg = mha_add_ln(trg, enc_out, prep_mask(src_mask), params["mha2"],
                     params["ln2"], n_heads)
    # sub-layer 3: (Switch) feed-forward + residual + LayerNorm
    if n_experts > 1:
        out = switch_ffn_add_ln(trg, params["ff"], params["ln3"], n_experts)
    else:
        out = ffn_add_ln(trg.reshape(B * S, D), params["ff"],
                         params["ln3"]).reshape(B, S, D)
    return out.astype(jnp.float32)


# ----------------------------------------------------------------------------
# Deterministic parameter init (bf16 weights, f32 LayerNorm params).
# Linear weights are stored [in, out] so kernels compute y = x @ W + b; the
# attention projections are additionally pre-split per head: (H, D, hd) /
# (H, hd, D) so BlockSpecs (not in-kernel slices) deliver head slices.
# ----------------------------------------------------------------------------
def init_params(key, d_model, n_heads, ff_dim, n_experts):
    keys = jax.random.split(key, 64)
    kit = iter(keys)
    hd = d_model // n_heads

    def lin(in_f, out_f):
        w = (jax.random.normal(next(kit), (in_f, out_f), jnp.float32) * 0.05)
        b = (jax.random.normal(next(kit), (1, out_f), jnp.float32) * 0.05)
        return w.astype(jnp.bfloat16), b.astype(jnp.bfloat16)

    def split_w(w):       # (D, D) [in, out] -> (H, D, hd)
        return jnp.transpose(w.reshape(d_model, n_heads, hd), (1, 0, 2))

    def split_b(b):       # (1, D) -> (H, 1, hd)
        return jnp.transpose(b.reshape(1, n_heads, hd), (1, 0, 2))

    def mha_p():
        wq, bq = lin(d_model, d_model)
        wk, bk = lin(d_model, d_model)
        wv, bv = lin(d_model, d_model)
        wo, bo = lin(d_model, d_model)
        return dict(wq=split_w(wq), bq=split_b(bq),
                    wk=split_w(wk), bk=split_b(bk),
                    wv=split_w(wv), bv=split_b(bv),
                    wo=wo.reshape(n_heads, hd, d_model),   # ctx rows grouped by head
                    bo=bo)

    def ln_p():
        return dict(gamma=jnp.ones((1, d_model), jnp.float32),
                    beta=jnp.zeros((1, d_model), jnp.float32))

    params = dict(mha1=mha_p(), mha2=mha_p(), ln1=ln_p(), ln2=ln_p(), ln3=ln_p())
    if n_experts > 1:
        ws, bs = lin(d_model, n_experts)
        w1s, b1s, w2s, b2s = [], [], [], []
        for _ in range(n_experts):
            w1, b1 = lin(d_model, ff_dim)
            w2, b2 = lin(ff_dim, d_model)
            w1s.append(w1); b1s.append(b1); w2s.append(w2); b2s.append(b2)
        params["ff"] = dict(ws=ws, bs=bs,
                            w1=jnp.stack(w1s), b1=jnp.stack(b1s),   # (E,D,F), (E,1,F)
                            w2=jnp.stack(w2s), b2=jnp.stack(b2s))   # (E,F,D), (E,1,D)
    else:
        w1, b1 = lin(d_model, ff_dim)
        w2, b2 = lin(ff_dim, d_model)
        params["ff"] = dict(w1=w1, b1=b1, w2=w2, b2=b2)
    return params


if __name__ == "__main__":
    # lane-dense d_model (multiple of 128) and head_dim >= 64 per the review
    D_MODEL, N_HEADS, FF_DIM = 128, 2, 256
    B, S_TRG, S_SRC = 2, 8, 16

    key = jax.random.PRNGKey(0)
    k_p1, k_p2, k_trg, k_enc = jax.random.split(key, 4)

    trg = jax.random.normal(k_trg, (B, S_TRG, D_MODEL), jnp.float32)
    enc_out = jax.random.normal(k_enc, (B, S_SRC, D_MODEL), jnp.float32)
    # standard decoder masks: causal target mask, padding source mask
    trg_mask = jnp.broadcast_to(jnp.tril(jnp.ones((S_TRG, S_TRG), jnp.float32)),
                                (B, 1, S_TRG, S_TRG))
    src_mask = jnp.ones((B, 1, 1, S_SRC), jnp.float32).at[1, :, :, -4:].set(0.0)

    # dense FeedForward path (n_experts == 1)
    params_dense = init_params(k_p1, D_MODEL, N_HEADS, FF_DIM, 1)
    fwd_dense = jax.jit(functools.partial(decoder_layer, n_heads=N_HEADS,
                                          n_experts=1))
    out_dense = fwd_dense(params_dense, trg, enc_out, trg_mask, src_mask)

    # Switch-MoE path (n_experts == 2)
    params_moe = init_params(k_p2, D_MODEL, N_HEADS, FF_DIM, 2)
    fwd_moe = jax.jit(functools.partial(decoder_layer, n_heads=N_HEADS,
                                        n_experts=2))
    out_moe = fwd_moe(params_moe, trg, enc_out, trg_mask, src_mask)

    jax.block_until_ready((out_dense, out_moe))
    assert out_dense.shape == (B, S_TRG, D_MODEL)
    assert out_moe.shape == (B, S_TRG, D_MODEL)
    assert bool(jnp.all(jnp.isfinite(out_dense)))
    assert bool(jnp.all(jnp.isfinite(out_moe)))
    print("KERNEL_OK")
</pallas_src>

<mosaic_0001>
module attributes {stable_mosaic.version = 11 : i64} {
  func.func @_ffn_ln_kernel(%arg0: i32, %arg1: memref<16x128xbf16, #tpu.memory_space<vmem>>, %arg2: memref<128x256xbf16, #tpu.memory_space<vmem>>, %arg3: memref<1x256xbf16, #tpu.memory_space<vmem>>, %arg4: memref<256x128xbf16, #tpu.memory_space<vmem>>, %arg5: memref<1x128xbf16, #tpu.memory_space<vmem>>, %arg6: memref<1x128xf32, #tpu.memory_space<vmem>>, %arg7: memref<1x128xf32, #tpu.memory_space<vmem>>, %arg8: memref<16x128xbf16, #tpu.memory_space<vmem>>) attributes {dimension_semantics = [#tpu.dimension_semantics<parallel>], iteration_bounds = array<i64: 1>, scalar_prefetch = 0 : i64, scratch_operands = 0 : i64, tpu.core_type = #tpu.core_type<tc>, window_params = [{transform_indices = @transform_0, window_bounds = array<i64: 16, 128>}, {pipeline_mode = #tpu.pipeline_mode<synchronous>, transform_indices = @transform_1, window_bounds = array<i64: 128, 256>}, {pipeline_mode = #tpu.pipeline_mode<synchronous>, transform_indices = @transform_2, window_bounds = array<i64: 1, 256>}, {pipeline_mode = #tpu.pipeline_mode<synchronous>, transform_indices = @transform_3, window_bounds = array<i64: 256, 128>}, {pipeline_mode = #tpu.pipeline_mode<synchronous>, transform_indices = @transform_4, window_bounds = array<i64: 1, 128>}, {pipeline_mode = #tpu.pipeline_mode<synchronous>, transform_indices = @transform_5, window_bounds = array<i64: 1, 128>}, {pipeline_mode = #tpu.pipeline_mode<synchronous>, transform_indices = @transform_6, window_bounds = array<i64: 1, 128>}, {transform_indices = @transform_7, window_bounds = array<i64: 16, 128>}]} {
    %c0 = arith.constant 0 : index
    %c0_0 = arith.constant 0 : index
    %0 = vector.load %arg1[%c0, %c0_0] : memref<16x128xbf16, #tpu.memory_space<vmem>>, vector<16x128xbf16>
    %c0_1 = arith.constant 0 : index
    %c0_2 = arith.constant 0 : index
    %1 = vector.load %arg2[%c0_1, %c0_2] : memref<128x256xbf16, #tpu.memory_space<vmem>>, vector<128x256xbf16>
    %cst = arith.constant dense<0.000000e+00> : vector<16x256xf32>
    %2 = tpu.matmul %0, %1, %cst {dimension_numbers = #tpu.dot_dimension_numbers<[1], [0], [0], [1], [0, 0, 1, 1], [], []>} : vector<16x128xbf16>, vector<128x256xbf16>, vector<16x256xf32> -> vector<16x256xf32>
    %c0_3 = arith.constant 0 : index
    %c0_4 = arith.constant 0 : index
    %3 = vector.load %arg3[%c0_3, %c0_4] : memref<1x256xbf16, #tpu.memory_space<vmem>>, vector<1x256xbf16>
    %4 = arith.extf %3 : vector<1x256xbf16> to vector<1x256xf32>
    %5 = vector.broadcast %4 : vector<1x256xf32> to vector<16x256xf32>
    %6 = arith.addf %2, %5 : vector<16x256xf32>
    %cst_5 = arith.constant 0.000000e+00 : f32
    %7 = vector.broadcast %cst_5 : f32 to vector<16x256xf32>
    %8 = arith.maximumf %6, %7 : vector<16x256xf32>
    %9 = arith.truncf %8 : vector<16x256xf32> to vector<16x256xbf16>
    %c0_6 = arith.constant 0 : index
    %c0_7 = arith.constant 0 : index
    %10 = vector.load %arg4[%c0_6, %c0_7] : memref<256x128xbf16, #tpu.memory_space<vmem>>, vector<256x128xbf16>
    %cst_8 = arith.constant dense<0.000000e+00> : vector<16x128xf32>
    %11 = tpu.matmul %9, %10, %cst_8 {dimension_numbers = #tpu.dot_dimension_numbers<[1], [0], [0], [1], [0, 0, 1, 1], [], []>} : vector<16x256xbf16>, vector<256x128xbf16>, vector<16x128xf32> -> vector<16x128xf32>
    %c0_9 = arith.constant 0 : index
    %c0_10 = arith.constant 0 : index
    %12 = vector.load %arg5[%c0_9, %c0_10] : memref<1x128xbf16, #tpu.memory_space<vmem>>, vector<1x128xbf16>
    %13 = arith.extf %12 : vector<1x128xbf16> to vector<1x128xf32>
    %14 = vector.broadcast %13 : vector<1x128xf32> to vector<16x128xf32>
    %15 = arith.addf %11, %14 : vector<16x128xf32>
    %16 = arith.extf %0 : vector<16x128xbf16> to vector<16x128xf32>
    %17 = arith.addf %16, %15 : vector<16x128xf32>
    %c0_11 = arith.constant 0 : index
    %c0_12 = arith.constant 0 : index
    %18 = vector.load %arg6[%c0_11, %c0_12] : memref<1x128xf32, #tpu.memory_space<vmem>>, vector<1x128xf32>
    %c0_13 = arith.constant 0 : index
    %c0_14 = arith.constant 0 : index
    %19 = vector.load %arg7[%c0_13, %c0_14] : memref<1x128xf32, #tpu.memory_space<vmem>>, vector<1x128xf32>
    %cst_15 = arith.constant dense<0.000000e+00> : vector<16xf32>
    %20 = vector.multi_reduction <add>, %17, %cst_15 [1] : vector<16x128xf32> to vector<16xf32>
    %21 = vector.shape_cast %20 : vector<16xf32> to vector<16x1xf32>
    %cst_16 = arith.constant 1.280000e+02 : f32
    %22 = vector.broadcast %cst_16 : f32 to vector<16x1xf32>
    %23 = arith.divf %21, %22 : vector<16x1xf32>
    %24 = vector.broadcast %23 : vector<16x1xf32> to vector<16x128xf32>
    %25 = arith.subf %17, %24 : vector<16x128xf32>
    %26 = arith.mulf %25, %25 : vector<16x128xf32>
    %cst_17 = arith.constant dense<0.000000e+00> : vector<16xf32>
    %27 = vector.multi_reduction <add>, %26, %cst_17 [1] : vector<16x128xf32> to vector<16xf32>
    %28 = vector.shape_cast %27 : vector<16xf32> to vector<16x1xf32>
    %cst_18 = arith.constant 1.280000e+02 : f32
    %29 = vector.broadcast %cst_18 : f32 to vector<16x1xf32>
    %30 = arith.divf %28, %29 : vector<16x1xf32>
    %31 = vector.broadcast %23 : vector<16x1xf32> to vector<16x128xf32>
    %32 = arith.subf %17, %31 : vector<16x128xf32>
    %cst_19 = arith.constant 9.99999974E-6 : f32
    %33 = vector.broadcast %cst_19 : f32 to vector<16x1xf32>
    %34 = arith.addf %30, %33 : vector<16x1xf32>
    %35 = math.rsqrt %34 : vector<16x1xf32>
    %36 = vector.broadcast %35 : vector<16x1xf32> to vector<16x128xf32>
    %37 = arith.mulf %32, %36 : vector<16x128xf32>
    %38 = vector.broadcast %18 : vector<1x128xf32> to vector<16x128xf32>
    %39 = arith.mulf %37, %38 : vector<16x128xf32>
    %40 = vector.broadcast %19 : vector<1x128xf32> to vector<16x128xf32>
    %41 = arith.addf %39, %40 : vector<16x128xf32>
    %42 = arith.truncf %41 : vector<16x128xf32> to vector<16x128xbf16>
    %c0_20 = arith.constant 0 : index
    %c0_21 = arith.constant 0 : index
    %43 = vector.load %arg8[%c0_20, %c0_21] : memref<16x128xbf16, #tpu.memory_space<vmem>>, vector<16x128xbf16>
    tpu.vector_store %arg8[%c0_20, %c0_21], %42 {strides = array<i32>} : memref<16x128xbf16, #tpu.memory_space<vmem>>, vector<16x128xbf16>,
    return
  }
  func.func @transform_0(%arg0: i32) -> (i32, i32) {
    %c0_i32 = arith.constant 0 : i32
    %c0_i32_0 = arith.constant 0 : i32
    return %arg0, %c0_i32 : i32, i32
  }
  func.func @transform_1(%arg0: i32) -> (i32, i32) {
    %c0_i32 = arith.constant 0 : i32
    %c0_i32_0 = arith.constant 0 : i32
    %c0_i32_1 = arith.constant 0 : i32
    return %c0_i32, %c0_i32_0 : i32, i32
  }
  func.func @transform_2(%arg0: i32) -> (i32, i32) {
    %c0_i32 = arith.constant 0 : i32
    %c0_i32_0 = arith.constant 0 : i32
    %c0_i32_1 = arith.constant 0 : i32
    return %c0_i32, %c0_i32_0 : i32, i32
  }
  func.func @transform_3(%arg0: i32) -> (i32, i32) {
    %c0_i32 = arith.constant 0 : i32
    %c0_i32_0 = arith.constant 0 : i32
    %c0_i32_1 = arith.constant 0 : i32
    return %c0_i32, %c0_i32_0 : i32, i32
  }
  func.func @transform_4(%arg0: i32) -> (i32, i32) {
    %c0_i32 = arith.constant 0 : i32
    %c0_i32_0 = arith.constant 0 : i32
    %c0_i32_1 = arith.constant 0 : i32
    return %c0_i32, %c0_i32_0 : i32, i32
  }
  func.func @transform_5(%arg0: i32) -> (i32, i32) {
    %c0_i32 = arith.constant 0 : i32
    %c0_i32_0 = arith.constant 0 : i32
    %c0_i32_1 = arith.constant 0 : i32
    return %c0_i32, %c0_i32_0 : i32, i32
  }
  func.func @transform_6(%arg0: i32) -> (i32, i32) {
    %c0_i32 = arith.constant 0 : i32
    %c0_i32_0 = arith.constant 0 : i32
    %c0_i32_1 = arith.constant 0 : i32
    return %c0_i32, %c0_i32_0 : i32, i32
  }
  func.func @transform_7(%arg0: i32) -> (i32, i32) {
    %c0_i32 = arith.constant 0 : i32
    %c0_i32_0 = arith.constant 0 : i32
    return %arg0, %c0_i32 : i32, i32
  }
}

module attributes {stable_mosaic.version = 11 : i64} {
  func.func @_mha_ln_kernel(%arg0: i32, %arg1: i32, %arg2: memref<1x8x128xbf16, #tpu.memory_space<vmem>>, %arg3: memref<1x8x128xbf16, #tpu.memory_space<vmem>>, %arg4: memref<1x8x8xf32, #tpu.memory_space<vmem>>, %arg5: memref<1x128x64xbf16, #tpu.memory_space<vmem>>, %arg6: memref<1x1x64xbf16, #tpu.memory_space<vmem>>, %arg7: memref<1x128x64xbf16, #tpu.memory_space<vmem>>, %arg8: memref<1x1x64xbf16, #tpu.memory_space<vmem>>, %arg9: memref<1x128x64xbf16, #tpu.memory_space<vmem>>, %arg10: memref<1x1x64xbf16, #tpu.memory_space<vmem>>, %arg11: memref<1x64x128xbf16, #tpu.memory_space<vmem>>, %arg12: memref<1x128xbf16, #tpu.memory_space<vmem>>, %arg13: memref<1x128xf32, #tpu.memory_space<vmem>>, %arg14: memref<1x128xf32, #tpu.memory_space<vmem>>, %arg15: memref<1x8x128xbf16, #tpu.memory_space<vmem>>, %arg16: memref<8x128xf32, #tpu.memory_space<vmem>>) attributes {dimension_semantics = [#tpu.dimension_semantics<parallel>, #tpu.dimension_semantics<arbitrary>], iteration_bounds = array<i64: 2, 2>, scalar_prefetch = 0 : i64, scratch_operands = 1 : i64, tpu.core_type = #tpu.core_type<tc>, window_params = [{transform_indices = @transform_0, window_bounds = array<i64: 1, 8, 128>}, {transform_indices = @transform_1, window_bounds = array<i64: 1, 8, 128>}, {transform_indices = @transform_2, window_bounds = array<i64: 1, 8, 8>}, {transform_indices = @transform_3, window_bounds = array<i64: 1, 128, 64>}, {transform_indices = @transform_4, window_bounds = array<i64: 1, 1, 64>}, {transform_indices = @transform_5, window_bounds = array<i64: 1, 128, 64>}, {transform_indices = @transform_6, window_bounds = array<i64: 1, 1, 64>}, {transform_indices = @transform_7, window_bounds = array<i64: 1, 128, 64>}, {transform_indices = @transform_8, window_bounds = array<i64: 1, 1, 64>}, {transform_indices = @transform_9, window_bounds = array<i64: 1, 64, 128>}, {pipeline_mode = #tpu.pipeline_mode<synchronous>, transform_indices = @transform_10, window_bounds = array<i64: 1, 128>}, {pipeline_mode = #tpu.pipeline_mode<synchronous>, transform_indices = @transform_11, window_bounds = array<i64: 1, 128>}, {pipeline_mode = #tpu.pipeline_mode<synchronous>, transform_indices = @transform_12, window_bounds = array<i64: 1, 128>}, {transform_indices = @transform_13, window_bounds = array<i64: 1, 8, 128>}]} {
    %c0_i32 = arith.constant 0 : i32
    %0 = arith.cmpi eq, %arg1, %c0_i32 : i32
    %1 = arith.extui %0 : i1 to i32
    %c0_i32_0 = arith.constant 0 : i32
    %2 = arith.cmpi ne, %1, %c0_i32_0 : i32
    scf.if %2 {
      %cst_46 = arith.constant 0.000000e+00 : f32
      %66 = vector.broadcast %cst_46 : f32 to vector<8x128xf32>
      %c0_47 = arith.constant 0 : index
      %c0_48 = arith.constant 0 : index
      %67 = vector.load %arg16[%c0_47, %c0_48] : memref<8x128xf32, #tpu.memory_space<vmem>>, vector<8x128xf32>
      tpu.vector_store %arg16[%c0_47, %c0_48], %66 {strides = array<i32>} : memref<8x128xf32, #tpu.memory_space<vmem>>, vector<8x128xf32>,
    } else {
    }
    %c0 = arith.constant 0 : index
    %c0_1 = arith.constant 0 : index
    %c0_2 = arith.constant 0 : index
    %3 = vector.load %arg2[%c0, %c0_1, %c0_2] : memref<1x8x128xbf16, #tpu.memory_space<vmem>>, vector<1x8x128xbf16>
    %4 = vector.shape_cast %3 : vector<1x8x128xbf16> to vector<8x128xbf16>
    %c0_3 = arith.constant 0 : index
    %c0_4 = arith.constant 0 : index
    %c0_5 = arith.constant 0 : index
    %5 = vector.load %arg3[%c0_3, %c0_4, %c0_5] : memref<1x8x128xbf16, #tpu.memory_space<vmem>>, vector<1x8x128xbf16>
    %6 = vector.shape_cast %5 : vector<1x8x128xbf16> to vector<8x128xbf16>
    %c0_6 = arith.constant 0 : index
    %c0_7 = arith.constant 0 : index
    %c0_8 = arith.constant 0 : index
    %7 = vector.load %arg5[%c0_6, %c0_7, %c0_8] : memref<1x128x64xbf16, #tpu.memory_space<vmem>>, vector<1x128x64xbf16>
    %8 = vector.shape_cast %7 : vector<1x128x64xbf16> to vector<128x64xbf16>
    %cst = arith.constant dense<0.000000e+00> : vector<8x64xf32>
    %9 = tpu.matmul %4, %8, %cst {dimension_numbers = #tpu.dot_dimension_numbers<[1], [0], [0], [1], [0, 0, 1, 1], [], []>} : vector<8x128xbf16>, vector<128x64xbf16>, vector<8x64xf32> -> vector<8x64xf32>
    %c0_9 = arith.constant 0 : index
    %c0_10 = arith.constant 0 : index
    %c0_11 = arith.constant 0 : index
    %10 = vector.load %arg6[%c0_9, %c0_10, %c0_11] : memref<1x1x64xbf16, #tpu.memory_space<vmem>>, vector<1x1x64xbf16>
    %11 = vector.shape_cast %10 : vector<1x1x64xbf16> to vector<1x64xbf16>
    %12 = arith.extf %11 : vector<1x64xbf16> to vector<1x64xf32>
    %13 = vector.broadcast %12 : vector<1x64xf32> to vector<8x64xf32>
    %14 = arith.addf %9, %13 : vector<8x64xf32>
    %cst_12 = arith.constant 1.250000e-01 : f32
    %15 = vector.broadcast %cst_12 : f32 to vector<8x64xf32>
    %16 = arith.mulf %14, %15 : vector<8x64xf32>
    %c0_13 = arith.constant 0 : index
    %c0_14 = arith.constant 0 : index
    %c0_15 = arith.constant 0 : index
    %17 = vector.load %arg7[%c0_13, %c0_14, %c0_15] : memref<1x128x64xbf16, #tpu.memory_space<vmem>>, vector<1x128x64xbf16>
    %18 = vector.shape_cast %17 : vector<1x128x64xbf16> to vector<128x64xbf16>
    %cst_16 = arith.constant dense<0.000000e+00> : vector<8x64xf32>
    %19 = tpu.matmul %6, %18, %cst_16 {dimension_numbers = #tpu.dot_dimension_numbers<[1], [0], [0], [1], [0, 0, 1, 1], [], []>} : vector<8x128xbf16>, vector<128x64xbf16>, vector<8x64xf32> -> vector<8x64xf32>
    %c0_17 = arith.constant 0 : index
    %c0_18 = arith.constant 0 : index
    %c0_19 = arith.constant 0 : index
    %20 = vector.load %arg8[%c0_17, %c0_18, %c0_19] : memref<1x1x64xbf16, #tpu.memory_space<vmem>>, vector<1x1x64xbf16>
    %21 = vector.shape_cast %20 : vector<1x1x64xbf16> to vector<1x64xbf16>
    %22 = arith.extf %21 : vector<1x64xbf16> to vector<1x64xf32>
    %23 = vector.broadcast %22 : vector<1x64xf32> to vector<8x64xf32>
    %24 = arith.addf %19, %23 : vector<8x64xf32>
    %c0_20 = arith.constant 0 : index
    %c0_21 = arith.constant 0 : index
    %c0_22 = arith.constant 0 : index
    %25 = vector.load %arg9[%c0_20, %c0_21, %c0_22] : memref<1x128x64xbf16, #tpu.memory_space<vmem>>, vector<1x128x64xbf16>
    %26 = vector.shape_cast %25 : vector<1x128x64xbf16> to vector<128x64xbf16>
    %cst_23 = arith.constant dense<0.000000e+00> : vector<8x64xf32>
    %27 = tpu.matmul %6, %26, %cst_23 {dimension_numbers = #tpu.dot_dimension_numbers<[1], [0], [0], [1], [0, 0, 1, 1], [], []>} : vector<8x128xbf16>, vector<128x64xbf16>, vector<8x64xf32> -> vector<8x64xf32>
    %c0_24 = arith.constant 0 : index
    %c0_25 = arith.constant 0 : index
    %c0_26 = arith.constant 0 : index
    %28 = vector.load %arg10[%c0_24, %c0_25, %c0_26] : memref<1x1x64xbf16, #tpu.memory_space<vmem>>, vector<1x1x64xbf16>
    %29 = vector.shape_cast %28 : vector<1x1x64xbf16> to vector<1x64xbf16>
    %30 = arith.extf %29 : vector<1x64xbf16> to vector<1x64xf32>
    %31 = vector.broadcast %30 : vector<1x64xf32> to vector<8x64xf32>
    %32 = arith.addf %27, %31 : vector<8x64xf32>
    %33 = arith.truncf %16 : vector<8x64xf32> to vector<8x64xbf16>
    %34 = arith.truncf %24 : vector<8x64xf32> to vector<8x64xbf16>
    %cst_27 = arith.constant dense<0.000000e+00> : vector<8x8xf32>
    %35 = tpu.matmul %33, %34, %cst_27 {dimension_numbers = #tpu.dot_dimension_numbers<[1], [1], [0], [0], [0, 0, 1, 0], [], []>} : vector<8x64xbf16>, vector<8x64xbf16>, vector<8x8xf32> -> vector<8x8xf32>
    %c0_28 = arith.constant 0 : index
    %c0_29 = arith.constant 0 : index
    %c0_30 = arith.constant 0 : index
    %36 = vector.load %arg4[%c0_28, %c0_29, %c0_30] : memref<1x8x8xf32, #tpu.memory_space<vmem>>, vector<1x8x8xf32>
    %37 = vector.shape_cast %36 : vector<1x8x8xf32> to vector<8x8xf32>
    %cst_31 = arith.constant 0.000000e+00 : f32
    %38 = vector.broadcast %cst_31 : f32 to vector<8x8xf32>
    %39 = arith.cmpf oeq, %37, %38 : vector<8x8xf32>
    %cst_32 = arith.constant -1.000000e+10 : f32
    %40 = vector.broadcast %cst_32 : f32 to vector<8x8xf32>
    %41 = arith.select %39, %40, %35 : vector<8x8xi1>, vector<8x8xf32>
    %cst_33 = arith.constant dense<0xFF800000> : vector<8xf32>
    %42 = vector.multi_reduction <maximumf>, %41, %cst_33 [1] : vector<8x8xf32> to vector<8xf32>
    %cst_34 = arith.constant 0xFF800000 : f32
    %43 = vector.broadcast %cst_34 : f32 to vector<8xf32>
    %44 = arith.maximumf %43, %42 : vector<8xf32>
    %45 = vector.shape_cast %44 : vector<8xf32> to vector<8x1xf32>
    %46 = vector.broadcast %45 : vector<8x1xf32> to vector<8x8xf32>
    %47 = arith.subf %41, %46 : vector<8x8xf32>
    %48 = math.exp %47 : vector<8x8xf32>
    %cst_35 = arith.constant dense<0.000000e+00> : vector<8xf32>
    %49 = vector.multi_reduction <add>, %48, %cst_35 [1] : vector<8x8xf32> to vector<8xf32>
    %50 = vector.shape_cast %49 : vector<8xf32> to vector<8x1xf32>
    %51 = vector.broadcast %50 : vector<8x1xf32> to vector<8x8xf32>
    %52 = arith.divf %48, %51 : vector<8x8xf32>
    %53 = arith.truncf %52 : vector<8x8xf32> to vector<8x8xbf16>
    %54 = arith.truncf %32 : vector<8x64xf32> to vector<8x64xbf16>
    %cst_36 = arith.constant dense<0.000000e+00> : vector<8x64xf32>
    %55 = tpu.matmul %53, %54, %cst_36 {dimension_numbers = #tpu.dot_dimension_numbers<[1], [0], [0], [1], [0, 0, 1, 1], [], []>} : vector<8x8xbf16>, vector<8x64xbf16>, vector<8x64xf32> -> vector<8x64xf32>
    %c0_37 = arith.constant 0 : index
    %c0_38 = arith.constant 0 : index
    %56 = vector.load %arg16[%c0_37, %c0_38] : memref<8x128xf32, #tpu.memory_space<vmem>>, vector<8x128xf32>
    %57 = arith.truncf %55 : vector<8x64xf32> to vector<8x64xbf16>
    %c0_39 = arith.constant 0 : index
    %c0_40 = arith.constant 0 : index
    %c0_41 = arith.constant 0 : index
    %58 = vector.load %arg11[%c0_39, %c0_40, %c0_41] : memref<1x64x128xbf16, #tpu.memory_space<vmem>>, vector<1x64x128xbf16>
    %59 = vector.shape_cast %58 : vector<1x64x128xbf16> to vector<64x128xbf16>
    %cst_42 = arith.constant dense<0.000000e+00> : vector<8x128xf32>
    %60 = tpu.matmul %57, %59, %cst_42 {dimension_numbers = #tpu.dot_dimension_numbers<[1], [0], [0], [1], [0, 0, 1, 1], [], []>} : vector<8x64xbf16>, vector<64x128xbf16>, vector<8x128xf32> -> vector<8x128xf32>
    %61 = arith.addf %56, %60 : vector<8x128xf32>
    %c0_43 = arith.constant 0 : index
    %c0_44 = arith.constant 0 : index
    %62 = vector.load %arg16[%c0_43, %c0_44] : memref<8x128xf32, #tpu.memory_space<vmem>>, vector<8x128xf32>
    tpu.vector_store %arg16[%c0_43, %c0_44], %61 {strides = array<i32>} : memref<8x128xf32, #tpu.memory_space<vmem>>, vector<8x128xf32>,
    %c1_i32 = arith.constant 1 : i32
    %63 = arith.cmpi eq, %arg1, %c1_i32 : i32
    %64 = arith.extui %63 : i1 to i32
    %c0_i32_45 = arith.constant 0 : i32
    %65 = arith.cmpi ne, %64, %c0_i32_45 : i32
    scf.if %65 {
      %c0_46 = arith.constant 0 : index
      %c0_47 = arith.constant 0 : index
      %66 = vector.load %arg16[%c0_46, %c0_47] : memref<8x128xf32, #tpu.memory_space<vmem>>, vector<8x128xf32>
      %c0_48 = arith.constant 0 : index
      %c0_49 = arith.constant 0 : index
      %67 = vector.load %arg12[%c0_48, %c0_49] : memref<1x128xbf16, #tpu.memory_space<vmem>>, vector<1x128xbf16>
      %68 = arith.extf %67 : vector<1x128xbf16> to vector<1x128xf32>
      %69 = vector.broadcast %68 : vector<1x128xf32> to vector<8x128xf32>
      %70 = arith.addf %66, %69 : vector<8x128xf32>
      %71 = arith.extf %4 : vector<8x128xbf16> to vector<8x128xf32>
      %72 = arith.addf %71, %70 : vector<8x128xf32>
      %c0_50 = arith.constant 0 : index
      %c0_51 = arith.constant 0 : index
      %73 = vector.load %arg13[%c0_50, %c0_51] : memref<1x128xf32, #tpu.memory_space<vmem>>, vector<1x128xf32>
      %c0_52 = arith.constant 0 : index
      %c0_53 = arith.constant 0 : index
      %74 = vector.load %arg14[%c0_52, %c0_53] : memref<1x128xf32, #tpu.memory_space<vmem>>, vector<1x128xf32>
      %cst_54 = arith.constant dense<0.000000e+00> : vector<8xf32>
      %75 = vector.multi_reduction <add>, %72, %cst_54 [1] : vector<8x128xf32> to vector<8xf32>
      %76 = vector.shape_cast %75 : vector<8xf32> to vector<8x1xf32>
      %cst_55 = arith.constant 1.280000e+02 : f32
      %77 = vector.broadcast %cst_55 : f32 to vector<8x1xf32>
      %78 = arith.divf %76, %77 : vector<8x1xf32>
      %79 = vector.broadcast %78 : vector<8x1xf32> to vector<8x128xf32>
      %80 = arith.subf %72, %79 : vector<8x128xf32>
      %81 = arith.mulf %80, %80 : vector<8x128xf32>
      %cst_56 = arith.constant dense<0.000000e+00> : vector<8xf32>
      %82 = vector.multi_reduction <add>, %81, %cst_56 [1] : vector<8x128xf32> to vector<8xf32>
      %83 = vector.shape_cast %82 : vector<8xf32> to vector<8x1xf32>
      %cst_57 = arith.constant 1.280000e+02 : f32
      %84 = vector.broadcast %cst_57 : f32 to vector<8x1xf32>
      %85 = arith.divf %83, %84 : vector<8x1xf32>
      %86 = vector.broadcast %78 : vector<8x1xf32> to vector<8x128xf32>
      %87 = arith.subf %72, %86 : vector<8x128xf32>
      %cst_58 = arith.constant 9.99999974E-6 : f32
      %88 = vector.broadcast %cst_58 : f32 to vector<8x1xf32>
      %89 = arith.addf %85, %88 : vector<8x1xf32>
      %90 = math.rsqrt %89 : vector<8x1xf32>
      %91 = vector.broadcast %90 : vector<8x1xf32> to vector<8x128xf32>
      %92 = arith.mulf %87, %91 : vector<8x128xf32>
      %93 = vector.broadcast %73 : vector<1x128xf32> to vector<8x128xf32>
      %94 = arith.mulf %92, %93 : vector<8x128xf32>
      %95 = vector.broadcast %74 : vector<1x128xf32> to vector<8x128xf32>
      %96 = arith.addf %94, %95 : vector<8x128xf32>
      %97 = arith.truncf %96 : vector<8x128xf32> to vector<8x128xbf16>
      %c0_59 = arith.constant 0 : index
      %c0_60 = arith.constant 0 : index
      %c0_61 = arith.constant 0 : index
      %98 = vector.load %arg15[%c0_59, %c0_60, %c0_61] : memref<1x8x128xbf16, #tpu.memory_space<vmem>>, vector<1x8x128xbf16>
      %99 = vector.shape_cast %98 : vector<1x8x128xbf16> to vector<8x128xbf16>
      %100 = vector.shape_cast %97 : vector<8x128xbf16> to vector<1x8x128xbf16>
      tpu.vector_store %arg15[%c0_59, %c0_60, %c0_61], %100 {strides = array<i32>} : memref<1x8x128xbf16, #tpu.memory_space<vmem>>, vector<1x8x128xbf16>,
    } else {
    }
    return
  }
  func.func @transform_0(%arg0: i32, %arg1: i32) -> (i32, i32, i32) {
    %c0_i32 = arith.constant 0 : i32
    %c0_i32_0 = arith.constant 0 : i32
    %c0_i32_1 = arith.constant 0 : i32
    return %arg0, %c0_i32, %c0_i32_0 : i32, i32, i32
  }
  func.func @transform_1(%arg0: i32, %arg1: i32) -> (i32, i32, i32) {
    %c0_i32 = arith.constant 0 : i32
    %c0_i32_0 = arith.constant 0 : i32
    %c0_i32_1 = arith.constant 0 : i32
    return %arg0, %c0_i32, %c0_i32_0 : i32, i32, i32
  }
  func.func @transform_2(%arg0: i32, %arg1: i32) -> (i32, i32, i32) {
    %c0_i32 = arith.constant 0 : i32
    %c0_i32_0 = arith.constant 0 : i32
    %c0_i32_1 = arith.constant 0 : i32
    return %arg0, %c0_i32, %c0_i32_0 : i32, i32, i32
  }
  func.func @transform_3(%arg0: i32, %arg1: i32) -> (i32, i32, i32) {
    %c0_i32 = arith.constant 0 : i32
    %c0_i32_0 = arith.constant 0 : i32
    %c0_i32_1 = arith.constant 0 : i32
    return %arg1, %c0_i32, %c0_i32_0 : i32, i32, i32
  }
  func.func @transform_4(%arg0: i32, %arg1: i32) -> (i32, i32, i32) {
    %c0_i32 = arith.constant 0 : i32
    %c0_i32_0 = arith.constant 0 : i32
    %c0_i32_1 = arith.constant 0 : i32
    return %arg1, %c0_i32, %c0_i32_0 : i32, i32, i32
  }
  func.func @transform_5(%arg0: i32, %arg1: i32) -> (i32, i32, i32) {
    %c0_i32 = arith.constant 0 : i32
    %c0_i32_0 = arith.constant 0 : i32
    %c0_i32_1 = arith.constant 0 : i32
    return %arg1, %c0_i32, %c0_i32_0 : i32, i32, i32
  }
  func.func @transform_6(%arg0: i32, %arg1: i32) -> (i32, i32, i32) {
    %c0_i32 = arith.constant 0 : i32
    %c0_i32_0 = arith.constant 0 : i32
    %c0_i32_1 = arith.constant 0 : i32
    return %arg1, %c0_i32, %c0_i32_0 : i32, i32, i32
  }
  func.func @transform_7(%arg0: i32, %arg1: i32) -> (i32, i32, i32) {
    %c0_i32 = arith.constant 0 : i32
    %c0_i32_0 = arith.constant 0 : i32
    %c0_i32_1 = arith.constant 0 : i32
    return %arg1, %c0_i32, %c0_i32_0 : i32, i32, i32
  }
  func.func @transform_8(%arg0: i32, %arg1: i32) -> (i32, i32, i32) {
    %c0_i32 = arith.constant 0 : i32
    %c0_i32_0 = arith.constant 0 : i32
    %c0_i32_1 = arith.constant 0 : i32
    return %arg1, %c0_i32, %c0_i32_0 : i32, i32, i32
  }
  func.func @transform_9(%arg0: i32, %arg1: i32) -> (i32, i32, i32) {
    %c0_i32 = arith.constant 0 : i32
    %c0_i32_0 = arith.constant 0 : i32
    %c0_i32_1 = arith.constant 0 : i32
    return %arg1, %c0_i32, %c0_i32_0 : i32, i32, i32
  }
  func.func @transform_10(%arg0: i32, %arg1: i32) -> (i32, i32) {
    %c0_i32 = arith.constant 0 : i32
    %c0_i32_0 = arith.constant 0 : i32
    %c0_i32_1 = arith.constant 0 : i32
    return %c0_i32, %c0_i32_0 : i32, i32
  }
  func.func @transform_11(%arg0: i32, %arg1: i32) -> (i32, i32) {
    %c0_i32 = arith.constant 0 : i32
    %c0_i32_0 = arith.constant 0 : i32
    %c0_i32_1 = arith.constant 0 : i32
    return %c0_i32, %c0_i32_0 : i32, i32
  }
  func.func @transform_12(%arg0: i32, %arg1: i32) -> (i32, i32) {
    %c0_i32 = arith.constant 0 : i32
    %c0_i32_0 = arith.constant 0 : i32
    %c0_i32_1 = arith.constant 0 : i32
    return %c0_i32, %c0_i32_0 : i32, i32
  }
  func.func @transform_13(%arg0: i32, %arg1: i32) -> (i32, i32, i32) {
    %c0_i32 = arith.constant 0 : i32
    %c0_i32_0 = arith.constant 0 : i32
    %c0_i32_1 = arith.constant 0 : i32
    return %arg0, %c0_i32, %c0_i32_0 : i32, i32, i32
  }
}

module attributes {stable_mosaic.version = 11 : i64} {
  func.func @_mha_ln_kernel(%arg0: i32, %arg1: i32, %arg2: memref<1x8x128xbf16, #tpu.memory_space<vmem>>, %arg3: memref<1x16x128xbf16, #tpu.memory_space<vmem>>, %arg4: memref<1x1x16xf32, #tpu.memory_space<vmem>>, %arg5: memref<1x128x64xbf16, #tpu.memory_space<vmem>>, %arg6: memref<1x1x64xbf16, #tpu.memory_space<vmem>>, %arg7: memref<1x128x64xbf16, #tpu.memory_space<vmem>>, %arg8: memref<1x1x64xbf16, #tpu.memory_space<vmem>>, %arg9: memref<1x128x64xbf16, #tpu.memory_space<vmem>>, %arg10: memref<1x1x64xbf16, #tpu.memory_space<vmem>>, %arg11: memref<1x64x128xbf16, #tpu.memory_space<vmem>>, %arg12: memref<1x128xbf16, #tpu.memory_space<vmem>>, %arg13: memref<1x128xf32, #tpu.memory_space<vmem>>, %arg14: memref<1x128xf32, #tpu.memory_space<vmem>>, %arg15: memref<1x8x128xbf16, #tpu.memory_space<vmem>>, %arg16: memref<8x128xf32, #tpu.memory_space<vmem>>) attributes {dimension_semantics = [#tpu.dimension_semantics<parallel>, #tpu.dimension_semantics<arbitrary>], iteration_bounds = array<i64: 2, 2>, scalar_prefetch = 0 : i64, scratch_operands = 1 : i64, tpu.core_type = #tpu.core_type<tc>, window_params = [{transform_indices = @transform_0, window_bounds = array<i64: 1, 8, 128>}, {transform_indices = @transform_1, window_bounds = array<i64: 1, 16, 128>}, {transform_indices = @transform_2, window_bounds = array<i64: 1, 1, 16>}, {transform_indices = @transform_3, window_bounds = array<i64: 1, 128, 64>}, {transform_indices = @transform_4, window_bounds = array<i64: 1, 1, 64>}, {transform_indices = @transform_5, window_bounds = array<i64: 1, 128, 64>}, {transform_indices = @transform_6, window_bounds = array<i64: 1, 1, 64>}, {transform_indices = @transform_7, window_bounds = array<i64: 1, 128, 64>}, {transform_indices = @transform_8, window_bounds = array<i64: 1, 1, 64>}, {transform_indices = @transform_9, window_bounds = array<i64: 1, 64, 128>}, {pipeline_mode = #tpu.pipeline_mode<synchronous>, transform_indices = @transform_10, window_bounds = array<i64: 1, 128>}, {pipeline_mode = #tpu.pipeline_mode<synchronous>, transform_indices = @transform_11, window_bounds = array<i64: 1, 128>}, {pipeline_mode = #tpu.pipeline_mode<synchronous>, transform_indices = @transform_12, window_bounds = array<i64: 1, 128>}, {transform_indices = @transform_13, window_bounds = array<i64: 1, 8, 128>}]} {
    %c0_i32 = arith.constant 0 : i32
    %0 = arith.cmpi eq, %arg1, %c0_i32 : i32
    %1 = arith.extui %0 : i1 to i32
    %c0_i32_0 = arith.constant 0 : i32
    %2 = arith.cmpi ne, %1, %c0_i32_0 : i32
    scf.if %2 {
      %cst_46 = arith.constant 0.000000e+00 : f32
      %68 = vector.broadcast %cst_46 : f32 to vector<8x128xf32>
      %c0_47 = arith.constant 0 : index
      %c0_48 = arith.constant 0 : index
      %69 = vector.load %arg16[%c0_47, %c0_48] : memref<8x128xf32, #tpu.memory_space<vmem>>, vector<8x128xf32>
      tpu.vector_store %arg16[%c0_47, %c0_48], %68 {strides = array<i32>} : memref<8x128xf32, #tpu.memory_space<vmem>>, vector<8x128xf32>,
    } else {
    }
    %c0 = arith.constant 0 : index
    %c0_1 = arith.constant 0 : index
    %c0_2 = arith.constant 0 : index
    %3 = vector.load %arg2[%c0, %c0_1, %c0_2] : memref<1x8x128xbf16, #tpu.memory_space<vmem>>, vector<1x8x128xbf16>
    %4 = vector.shape_cast %3 : vector<1x8x128xbf16> to vector<8x128xbf16>
    %c0_3 = arith.constant 0 : index
    %c0_4 = arith.constant 0 : index
    %c0_5 = arith.constant 0 : index
    %5 = vector.load %arg3[%c0_3, %c0_4, %c0_5] : memref<1x16x128xbf16, #tpu.memory_space<vmem>>, vector<1x16x128xbf16>
    %6 = vector.shape_cast %5 : vector<1x16x128xbf16> to vector<16x128xbf16>
    %c0_6 = arith.constant 0 : index
    %c0_7 = arith.constant 0 : index
    %c0_8 = arith.constant 0 : index
    %7 = vector.load %arg5[%c0_6, %c0_7, %c0_8] : memref<1x128x64xbf16, #tpu.memory_space<vmem>>, vector<1x128x64xbf16>
    %8 = vector.shape_cast %7 : vector<1x128x64xbf16> to vector<128x64xbf16>
    %cst = arith.constant dense<0.000000e+00> : vector<8x64xf32>
    %9 = tpu.matmul %4, %8, %cst {dimension_numbers = #tpu.dot_dimension_numbers<[1], [0], [0], [1], [0, 0, 1, 1], [], []>} : vector<8x128xbf16>, vector<128x64xbf16>, vector<8x64xf32> -> vector<8x64xf32>
    %c0_9 = arith.constant 0 : index
    %c0_10 = arith.constant 0 : index
    %c0_11 = arith.constant 0 : index
    %10 = vector.load %arg6[%c0_9, %c0_10, %c0_11] : memref<1x1x64xbf16, #tpu.memory_space<vmem>>, vector<1x1x64xbf16>
    %11 = vector.shape_cast %10 : vector<1x1x64xbf16> to vector<1x64xbf16>
    %12 = arith.extf %11 : vector<1x64xbf16> to vector<1x64xf32>
    %13 = vector.broadcast %12 : vector<1x64xf32> to vector<8x64xf32>
    %14 = arith.addf %9, %13 : vector<8x64xf32>
    %cst_12 = arith.constant 1.250000e-01 : f32
    %15 = vector.broadcast %cst_12 : f32 to vector<8x64xf32>
    %16 = arith.mulf %14, %15 : vector<8x64xf32>
    %c0_13 = arith.constant 0 : index
    %c0_14 = arith.constant 0 : index
    %c0_15 = arith.constant 0 : index
    %17 = vector.load %arg7[%c0_13, %c0_14, %c0_15] : memref<1x128x64xbf16, #tpu.memory_space<vmem>>, vector<1x128x64xbf16>
    %18 = vector.shape_cast %17 : vector<1x128x64xbf16> to vector<128x64xbf16>
    %cst_16 = arith.constant dense<0.000000e+00> : vector<16x64xf32>
    %19 = tpu.matmul %6, %18, %cst_16 {dimension_numbers = #tpu.dot_dimension_numbers<[1], [0], [0], [1], [0, 0, 1, 1], [], []>} : vector<16x128xbf16>, vector<128x64xbf16>, vector<16x64xf32> -> vector<16x64xf32>
    %c0_17 = arith.constant 0 : index
    %c0_18 = arith.constant 0 : index
    %c0_19 = arith.constant 0 : index
    %20 = vector.load %arg8[%c0_17, %c0_18, %c0_19] : memref<1x1x64xbf16, #tpu.memory_space<vmem>>, vector<1x1x64xbf16>
    %21 = vector.shape_cast %20 : vector<1x1x64xbf16> to vector<1x64xbf16>
    %22 = arith.extf %21 : vector<1x64xbf16> to vector<1x64xf32>
    %23 = vector.broadcast %22 : vector<1x64xf32> to vector<16x64xf32>
    %24 = arith.addf %19, %23 : vector<16x64xf32>
    %c0_20 = arith.constant 0 : index
    %c0_21 = arith.constant 0 : index
    %c0_22 = arith.constant 0 : index
    %25 = vector.load %arg9[%c0_20, %c0_21, %c0_22] : memref<1x128x64xbf16, #tpu.memory_space<vmem>>, vector<1x128x64xbf16>
    %26 = vector.shape_cast %25 : vector<1x128x64xbf16> to vector<128x64xbf16>
    %cst_23 = arith.constant dense<0.000000e+00> : vector<16x64xf32>
    %27 = tpu.matmul %6, %26, %cst_23 {dimension_numbers = #tpu.dot_dimension_numbers<[1], [0], [0], [1], [0, 0, 1, 1], [], []>} : vector<16x128xbf16>, vector<128x64xbf16>, vector<16x64xf32> -> vector<16x64xf32>
    %c0_24 = arith.constant 0 : index
    %c0_25 = arith.constant 0 : index
    %c0_26 = arith.constant 0 : index
    %28 = vector.load %arg10[%c0_24, %c0_25, %c0_26] : memref<1x1x64xbf16, #tpu.memory_space<vmem>>, vector<1x1x64xbf16>
    %29 = vector.shape_cast %28 : vector<1x1x64xbf16> to vector<1x64xbf16>
    %30 = arith.extf %29 : vector<1x64xbf16> to vector<1x64xf32>
    %31 = vector.broadcast %30 : vector<1x64xf32> to vector<16x64xf32>
    %32 = arith.addf %27, %31 : vector<16x64xf32>
    %33 = arith.truncf %16 : vector<8x64xf32> to vector<8x64xbf16>
    %34 = arith.truncf %24 : vector<16x64xf32> to vector<16x64xbf16>
    %cst_27 = arith.constant dense<0.000000e+00> : vector<8x16xf32>
    %35 = tpu.matmul %33, %34, %cst_27 {dimension_numbers = #tpu.dot_dimension_numbers<[1], [1], [0], [0], [0, 0, 1, 0], [], []>} : vector<8x64xbf16>, vector<16x64xbf16>, vector<8x16xf32> -> vector<8x16xf32>
    %c0_28 = arith.constant 0 : index
    %c0_29 = arith.constant 0 : index
    %c0_30 = arith.constant 0 : index
    %36 = vector.load %arg4[%c0_28, %c0_29, %c0_30] : memref<1x1x16xf32, #tpu.memory_space<vmem>>, vector<1x1x16xf32>
    %37 = vector.shape_cast %36 : vector<1x1x16xf32> to vector<1x16xf32>
    %cst_31 = arith.constant 0.000000e+00 : f32
    %38 = vector.broadcast %cst_31 : f32 to vector<1x16xf32>
    %39 = arith.cmpf oeq, %37, %38 : vector<1x16xf32>
    %cst_32 = arith.constant -1.000000e+10 : f32
    %40 = vector.shape_cast %39 : vector<1x16xi1> to vector<1x16xi1>
    %41 = vector.broadcast %40 : vector<1x16xi1> to vector<8x16xi1>
    %42 = vector.broadcast %cst_32 : f32 to vector<8x16xf32>
    %43 = arith.select %41, %42, %35 : vector<8x16xi1>, vector<8x16xf32>
    %cst_33 = arith.constant dense<0xFF800000> : vector<8xf32>
    %44 = vector.multi_reduction <maximumf>, %43, %cst_33 [1] : vector<8x16xf32> to vector<8xf32>
    %cst_34 = arith.constant 0xFF800000 : f32
    %45 = vector.broadcast %cst_34 : f32 to vector<8xf32>
    %46 = arith.maximumf %45, %44 : vector<8xf32>
    %47 = vector.shape_cast %46 : vector<8xf32> to vector<8x1xf32>
    %48 = vector.broadcast %47 : vector<8x1xf32> to vector<8x16xf32>
    %49 = arith.subf %43, %48 : vector<8x16xf32>
    %50 = math.exp %49 : vector<8x16xf32>
    %cst_35 = arith.constant dense<0.000000e+00> : vector<8xf32>
    %51 = vector.multi_reduction <add>, %50, %cst_35 [1] : vector<8x16xf32> to vector<8xf32>
    %52 = vector.shape_cast %51 : vector<8xf32> to vector<8x1xf32>
    %53 = vector.broadcast %52 : vector<8x1xf32> to vector<8x16xf32>
    %54 = arith.divf %50, %53 : vector<8x16xf32>
    %55 = arith.truncf %54 : vector<8x16xf32> to vector<8x16xbf16>
    %56 = arith.truncf %32 : vector<16x64xf32> to vector<16x64xbf16>
    %cst_36 = arith.constant dense<0.000000e+00> : vector<8x64xf32>
    %57 = tpu.matmul %55, %56, %cst_36 {dimension_numbers = #tpu.dot_dimension_numbers<[1], [0], [0], [1], [0, 0, 1, 1], [], []>} : vector<8x16xbf16>, vector<16x64xbf16>, vector<8x64xf32> -> vector<8x64xf32>
    %c0_37 = arith.constant 0 : index
    %c0_38 = arith.constant 0 : index
    %58 = vector.load %arg16[%c0_37, %c0_38] : memref<8x128xf32, #tpu.memory_space<vmem>>, vector<8x128xf32>
    %59 = arith.truncf %57 : vector<8x64xf32> to vector<8x64xbf16>
    %c0_39 = arith.constant 0 : index
    %c0_40 = arith.constant 0 : index
    %c0_41 = arith.constant 0 : index
    %60 = vector.load %arg11[%c0_39, %c0_40, %c0_41] : memref<1x64x128xbf16, #tpu.memory_space<vmem>>, vector<1x64x128xbf16>
    %61 = vector.shape_cast %60 : vector<1x64x128xbf16> to vector<64x128xbf16>
    %cst_42 = arith.constant dense<0.000000e+00> : vector<8x128xf32>
    %62 = tpu.matmul %59, %61, %cst_42 {dimension_numbers = #tpu.dot_dimension_numbers<[1], [0], [0], [1], [0, 0, 1, 1], [], []>} : vector<8x64xbf16>, vector<64x128xbf16>, vector<8x128xf32> -> vector<8x128xf32>
    %63 = arith.addf %58, %62 : vector<8x128xf32>
    %c0_43 = arith.constant 0 : index
    %c0_44 = arith.constant 0 : index
    %64 = vector.load %arg16[%c0_43, %c0_44] : memref<8x128xf32, #tpu.memory_space<vmem>>, vector<8x128xf32>
    tpu.vector_store %arg16[%c0_43, %c0_44], %63 {strides = array<i32>} : memref<8x128xf32, #tpu.memory_space<vmem>>, vector<8x128xf32>,
    %c1_i32 = arith.constant 1 : i32
    %65 = arith.cmpi eq, %arg1, %c1_i32 : i32
    %66 = arith.extui %65 : i1 to i32
    %c0_i32_45 = arith.constant 0 : i32
    %67 = arith.cmpi ne, %66, %c0_i32_45 : i32
    scf.if %67 {
      %c0_46 = arith.constant 0 : index
      %c0_47 = arith.constant 0 : index
      %68 = vector.load %arg16[%c0_46, %c0_47] : memref<8x128xf32, #tpu.memory_space<vmem>>, vector<8x128xf32>
      %c0_48 = arith.constant 0 : index
      %c0_49 = arith.constant 0 : index
      %69 = vector.load %arg12[%c0_48, %c0_49] : memref<1x128xbf16, #tpu.memory_space<vmem>>, vector<1x128xbf16>
      %70 = arith.extf %69 : vector<1x128xbf16> to vector<1x128xf32>
      %71 = vector.broadcast %70 : vector<1x128xf32> to vector<8x128xf32>
      %72 = arith.addf %68, %71 : vector<8x128xf32>
      %73 = arith.extf %4 : vector<8x128xbf16> to vector<8x128xf32>
      %74 = arith.addf %73, %72 : vector<8x128xf32>
      %c0_50 = arith.constant 0 : index
      %c0_51 = arith.constant 0 : index
      %75 = vector.load %arg13[%c0_50, %c0_51] : memref<1x128xf32, #tpu.memory_space<vmem>>, vector<1x128xf32>
      %c0_52 = arith.constant 0 : index
      %c0_53 = arith.constant 0 : index
      %76 = vector.load %arg14[%c0_52, %c0_53] : memref<1x128xf32, #tpu.memory_space<vmem>>, vector<1x128xf32>
      %cst_54 = arith.constant dense<0.000000e+00> : vector<8xf32>
      %77 = vector.multi_reduction <add>, %74, %cst_54 [1] : vector<8x128xf32> to vector<8xf32>
      %78 = vector.shape_cast %77 : vector<8xf32> to vector<8x1xf32>
      %cst_55 = arith.constant 1.280000e+02 : f32
      %79 = vector.broadcast %cst_55 : f32 to vector<8x1xf32>
      %80 = arith.divf %78, %79 : vector<8x1xf32>
      %81 = vector.broadcast %80 : vector<8x1xf32> to vector<8x128xf32>
      %82 = arith.subf %74, %81 : vector<8x128xf32>
      %83 = arith.mulf %82, %82 : vector<8x128xf32>
      %cst_56 = arith.constant dense<0.000000e+00> : vector<8xf32>
      %84 = vector.multi_reduction <add>, %83, %cst_56 [1] : vector<8x128xf32> to vector<8xf32>
      %85 = vector.shape_cast %84 : vector<8xf32> to vector<8x1xf32>
      %cst_57 = arith.constant 1.280000e+02 : f32
      %86 = vector.broadcast %cst_57 : f32 to vector<8x1xf32>
      %87 = arith.divf %85, %86 : vector<8x1xf32>
      %88 = vector.broadcast %80 : vector<8x1xf32> to vector<8x128xf32>
      %89 = arith.subf %74, %88 : vector<8x128xf32>
      %cst_58 = arith.constant 9.99999974E-6 : f32
      %90 = vector.broadcast %cst_58 : f32 to vector<8x1xf32>
      %91 = arith.addf %87, %90 : vector<8x1xf32>
      %92 = math.rsqrt %91 : vector<8x1xf32>
      %93 = vector.broadcast %92 : vector<8x1xf32> to vector<8x128xf32>
      %94 = arith.mulf %89, %93 : vector<8x128xf32>
      %95 = vector.broadcast %75 : vector<1x128xf32> to vector<8x128xf32>
      %96 = arith.mulf %94, %95 : vector<8x128xf32>
      %97 = vector.broadcast %76 : vector<1x128xf32> to vector<8x128xf32>
      %98 = arith.addf %96, %97 : vector<8x128xf32>
      %99 = arith.truncf %98 : vector<8x128xf32> to vector<8x128xbf16>
      %c0_59 = arith.constant 0 : index
      %c0_60 = arith.constant 0 : index
      %c0_61 = arith.constant 0 : index
      %100 = vector.load %arg15[%c0_59, %c0_60, %c0_61] : memref<1x8x128xbf16, #tpu.memory_space<vmem>>, vector<1x8x128xbf16>
      %101 = vector.shape_cast %100 : vector<1x8x128xbf16> to vector<8x128xbf16>
      %102 = vector.shape_cast %99 : vector<8x128xbf16> to vector<1x8x128xbf16>
      tpu.vector_store %arg15[%c0_59, %c0_60, %c0_61], %102 {strides = array<i32>} : memref<1x8x128xbf16, #tpu.memory_space<vmem>>, vector<1x8x128xbf16>,
    } else {
    }
    return
  }
  func.func @transform_0(%arg0: i32, %arg1: i32) -> (i32, i32, i32) {
    %c0_i32 = arith.constant 0 : i32
    %c0_i32_0 = arith.constant 0 : i32
    %c0_i32_1 = arith.constant 0 : i32
    return %arg0, %c0_i32, %c0_i32_0 : i32, i32, i32
  }
  func.func @transform_1(%arg0: i32, %arg1: i32) -> (i32, i32, i32) {
    %c0_i32 = arith.constant 0 : i32
    %c0_i32_0 = arith.constant 0 : i32
    %c0_i32_1 = arith.constant 0 : i32
    return %arg0, %c0_i32, %c0_i32_0 : i32, i32, i32
  }
  func.func @transform_2(%arg0: i32, %arg1: i32) -> (i32, i32, i32) {
    %c0_i32 = arith.constant 0 : i32
    %c0_i32_0 = arith.constant 0 : i32
    %c0_i32_1 = arith.constant 0 : i32
    return %arg0, %c0_i32, %c0_i32_0 : i32, i32, i32
  }
  func.func @transform_3(%arg0: i32, %arg1: i32) -> (i32, i32, i32) {
    %c0_i32 = arith.constant 0 : i32
    %c0_i32_0 = arith.constant 0 : i32
    %c0_i32_1 = arith.constant 0 : i32
    return %arg1, %c0_i32, %c0_i32_0 : i32, i32, i32
  }
  func.func @transform_4(%arg0: i32, %arg1: i32) -> (i32, i32, i32) {
    %c0_i32 = arith.constant 0 : i32
    %c0_i32_0 = arith.constant 0 : i32
    %c0_i32_1 = arith.constant 0 : i32
    return %arg1, %c0_i32, %c0_i32_0 : i32, i32, i32
  }
  func.func @transform_5(%arg0: i32, %arg1: i32) -> (i32, i32, i32) {
    %c0_i32 = arith.constant 0 : i32
    %c0_i32_0 = arith.constant 0 : i32
    %c0_i32_1 = arith.constant 0 : i32
    return %arg1, %c0_i32, %c0_i32_0 : i32, i32, i32
  }
  func.func @transform_6(%arg0: i32, %arg1: i32) -> (i32, i32, i32) {
    %c0_i32 = arith.constant 0 : i32
    %c0_i32_0 = arith.constant 0 : i32
    %c0_i32_1 = arith.constant 0 : i32
    return %arg1, %c0_i32, %c0_i32_0 : i32, i32, i32
  }
  func.func @transform_7(%arg0: i32, %arg1: i32) -> (i32, i32, i32) {
    %c0_i32 = arith.constant 0 : i32
    %c0_i32_0 = arith.constant 0 : i32
    %c0_i32_1 = arith.constant 0 : i32
    return %arg1, %c0_i32, %c0_i32_0 : i32, i32, i32
  }
  func.func @transform_8(%arg0: i32, %arg1: i32) -> (i32, i32, i32) {
    %c0_i32 = arith.constant 0 : i32
    %c0_i32_0 = arith.constant 0 : i32
    %c0_i32_1 = arith.constant 0 : i32
    return %arg1, %c0_i32, %c0_i32_0 : i32, i32, i32
  }
  func.func @transform_9(%arg0: i32, %arg1: i32) -> (i32, i32, i32) {
    %c0_i32 = arith.constant 0 : i32
    %c0_i32_0 = arith.constant 0 : i32
    %c0_i32_1 = arith.constant 0 : i32
    return %arg1, %c0_i32, %c0_i32_0 : i32, i32, i32
  }
  func.func @transform_10(%arg0: i32, %arg1: i32) -> (i32, i32) {
    %c0_i32 = arith.constant 0 : i32
    %c0_i32_0 = arith.constant 0 : i32
    %c0_i32_1 = arith.constant 0 : i32
    return %c0_i32, %c0_i32_0 : i32, i32
  }
  func.func @transform_11(%arg0: i32, %arg1: i32) -> (i32, i32) {
    %c0_i32 = arith.constant 0 : i32
    %c0_i32_0 = arith.constant 0 : i32
    %c0_i32_1 = arith.constant 0 : i32
    return %c0_i32, %c0_i32_0 : i32, i32
  }
  func.func @transform_12(%arg0: i32, %arg1: i32) -> (i32, i32) {
    %c0_i32 = arith.constant 0 : i32
    %c0_i32_0 = arith.constant 0 : i32
    %c0_i32_1 = arith.constant 0 : i32
    return %c0_i32, %c0_i32_0 : i32, i32
  }
  func.func @transform_13(%arg0: i32, %arg1: i32) -> (i32, i32, i32) {
    %c0_i32 = arith.constant 0 : i32
    %c0_i32_0 = arith.constant 0 : i32
    %c0_i32_1 = arith.constant 0 : i32
    return %arg0, %c0_i32, %c0_i32_0 : i32, i32, i32
  }
}

</mosaic_0001>

<bundles_post_ra>
// kernel: decoder_layer.5
= control target key start
LH: loop header
LB: loop body
LE: loop exit
PB: predicated region body
PF: predicated region fallthrough
CT: control target
= control target key end

     0   :  { %s788_s1 = inlined_call_operand.vmem [shape: bf16[128,256], index: 1, kind: input, shape index: {}]   ;;  %s789_s3 = inlined_call_operand.vmem [shape: bf16[256,128], index: 3, kind: input, shape index: {}]   ;;  %s790_s0 = inlined_call_operand.vmem [shape: bf16[16,128], index: 0, kind: input, shape index: {}]   ;;  %s791_s2 = inlined_call_operand.vmem [shape: bf16[1,256], index: 2, kind: input, shape index: {}]   ;;  %s792_s4 = inlined_call_operand.vmem [shape: bf16[1,128], index: 4, kind: input, shape index: {}]   ;;  %s793_s5 = inlined_call_operand.vmem [shape: f32[1,128], index: 5, kind: input, shape index: {}]   ;;  %s794_s6 = inlined_call_operand.vmem [shape: f32[1,128], index: 6, kind: input, shape index: {}]   ;;  %s795_s7 = inlined_call_operand.vmem [shape: bf16[16,128], index: 7, kind: output, shape index: {}]  }
   0x1   :  { %v465_v0 = vld [vmem:[%s788_s1 + $0x70] sm:$0xf]  ;;  %v551_v1 = vld [vmem:[%s788_s1 + $0x74] sm:$0xf0]  ;;  %v550_v2 = vld [vmem:[%s788_s1 + $0x74] sm:$0xf] }
   0x2   :  { %v466_v3 = vor.u32 %v551_v1, %v465_v0  ;;  %v467_v4 = vld [vmem:[%s788_s1 + $0x78] sm:$0xf0]  ;;  %v457_v5 = vld [vmem:[%s788_s1 + $0x60] sm:$0xf]  ;;  %v549_v6 = vld [vmem:[%s788_s1 + $0x64] sm:$0xf0] }
   0x3   :  { %v470_v7 = vor.u32 %v550_v2, %v467_v4  ;;  %v548_v8 = vld [vmem:[%s788_s1 + $0x64] sm:$0xf]  ;;  %v459_v9 = vld [vmem:[%s788_s1 + $0x68] sm:$0xf0]  ;;  %v458_v10 = vor.u32 %v549_v6, %v457_v5  ;;  %v449_v12 = vld [vmem:[%s788_s1 + $0x50] sm:$0xf] }
   0x4   :  { %139 = vmatpush.bf16.msra.mxu0 %v466_v3  ;;  %v462_v11 = vor.u32 %v548_v8, %v459_v9  ;;  %v547_v13 = vld [vmem:[%s788_s1 + $0x54] sm:$0xf0]  ;;  %v546_v14 = vld [vmem:[%s788_s1 + $0x54] sm:$0xf]  ;;  %v451_v15 = vld [vmem:[%s788_s1 + $0x58] sm:$0xf0] }
   0x5   :  { %153 = vmatpush.bf16.msra.mxu1 %v470_v7  ;;  %v450_v16 = vor.u32 %v547_v13, %v449_v12  ;;  %v454_v17 = vor.u32 %v546_v14, %v451_v15  ;;  %v441_v18 = vld [vmem:[%s788_s1 + $0x40] sm:$0xf]  ;;  %v545_v19 = vld [vmem:[%s788_s1 + $0x44] sm:$0xf0]  ;;  %v544_v20 = vld [vmem:[%s788_s1 + $0x44] sm:$0xf] }
   0x6   :  { %v443_v21 = vld [vmem:[%s788_s1 + $0x48] sm:$0xf0]  ;;  %v442_v22 = vor.u32 %v545_v19, %v441_v18  ;;  %v559_v23 = vld [vmem:[%s789_s3 + $0x38] sm:$0xff]  ;;  %v433_v26 = vld [vmem:[%s788_s1 + $0x30] sm:$0xf] }
   0x7   :  { %v567_v24 = vld [vmem:[%s789_s3 + $0x78] sm:$0xff]  ;;  %v446_v25 = vor.u32 %v544_v20, %v443_v21  ;;  %v542_v28 = vld [vmem:[%s788_s1 + $0x34] sm:$0xf]  ;;  %304 = vmatpush.bf16.msra.mxu2 %v559_v23  ;;  %v425_v34 = vld [vmem:[%s788_s1 + $0x20] sm:$0xf] }
   0x8   :  { %140 = vmatpush.bf16.msra.mxu0 %v458_v10  ;;  %v543_v27 = vld [vmem:[%s788_s1 + $0x34] sm:$0xf0]  ;;  %v435_v29 = vld [vmem:[%s788_s1 + $0x38] sm:$0xf0]  ;;  %318 = vmatpush.bf16.msra.mxu3 %v567_v24  ;;  %v558_v30 = vld [vmem:[%s789_s3 + $0x30] sm:$0xff] }
   0x9   :  { %154 = vmatpush.bf16.msra.mxu1 %v462_v11  ;;  %v566_v31 = vld [vmem:[%s789_s3 + $0x70] sm:$0xff]  ;;  %v434_v32 = vor.u32 %v543_v27, %v433_v26  ;;  %v438_v33 = vor.u32 %v542_v28, %v435_v29  ;;  %v541_v35 = vld [vmem:[%s788_s1 + $0x24] sm:$0xf0]  ;;  %v540_v36 = vld [vmem:[%s788_s1 + $0x24] sm:$0xf] }
   0xa   :  { %v427_v37 = vld [vmem:[%s788_s1 + $0x28] sm:$0xf0]  ;;  %v426_v40 = vor.u32 %v541_v35, %v425_v34  ;;  %v417_v42 = vld [vmem:[%s788_s1 + $0x10] sm:$0xf]  ;;  %v539_v43 = vld [vmem:[%s788_s1 + $0x14] sm:$0xf0] }
   0xb   :  { %305 = vmatpush.bf16.msra.mxu2 %v558_v30  ;;  %v557_v38 = vld [vmem:[%s789_s3 + $0x28] sm:$0xff]  ;;  %v430_v41 = vor.u32 %v540_v36, %v427_v37  ;;  %v538_v44 = vld [vmem:[%s788_s1 + $0x14] sm:$0xf]  ;;  %v419_v45 = vld [vmem:[%s788_s1 + $0x18] sm:$0xf0]  ;;  %v418_v48 = vor.u32 %v539_v43, %v417_v42  ;;  %v582_v37 = vmov 128.0  }
   0xc   :  { %141 = vmatpush.bf16.msra.mxu0 %v450_v16  ;;  %319 = vmatpush.bf16.msra.mxu3 %v566_v31  ;;  %v565_v39 = vld [vmem:[%s789_s3 + $0x68] sm:$0xff]  ;;  %v556_v46 = vld [vmem:[%s789_s3 + $0x20] sm:$0xff]  ;;  %v422_v49 = vor.u32 %v538_v44, %v419_v45  ;;  %v555_v57 = vld [vmem:[%s789_s3 + $0x18] sm:$0xff]  ;;  %576 = vrcp.f32 %v582_v37 }
   0xd   :  { %155 = vmatpush.bf16.msra.mxu1 %v454_v17  ;;  %v564_v47 = vld [vmem:[%s789_s3 + $0x60] sm:$0xff]  ;;  %v537_v51 = vld [vmem:[%s788_s1 + $0x4] sm:$0xf0]  ;;  %v411_v53 = vld [vmem:[%s788_s1 + $0x8] sm:$0xf0] }
   0xe   :  { %v409_v50 = vld [vmem:[%s788_s1] sm:$0xf]  ;;  %v536_v52 = vld [vmem:[%s788_s1 + $0x4] sm:$0xf]  ;;  %v563_v58 = vld [vmem:[%s789_s3 + $0x58] sm:$0xff] }
   0xf   :  { %306 = vmatpush.bf16.msra.mxu2 %v557_v38  ;;  %v410_v54 = vor.u32 %v537_v51, %v409_v50  ;;  %v414_v55 = vor.u32 %v536_v52, %v411_v53  ;;  %v535_v56 = vld [vmem:[%s790_s0] sm:$0xff]  ;;  %v554_v59 = vld [vmem:[%s789_s3 + $0x10] sm:$0xff]  ;;  %v553_v61 = vld [vmem:[%s789_s3 + $0x8] sm:$0xff] }
  0x10   :  { %142 = vmatpush.bf16.msra.mxu0 %v442_v22  ;;  %320 = vmatpush.bf16.msra.mxu3 %v565_v39  ;;  %v562_v60 = vld [vmem:[%s789_s3 + $0x50] sm:$0xff]  ;;  %v561_v62 = vld [vmem:[%s789_s3 + $0x48] sm:$0xff]  ;;  %v552_v63 = vld [vmem:[%s789_s3] sm:$0xff] }
  0x11   :  { %156 = vmatpush.bf16.msra.mxu1 %v446_v25  ;;  %v560_v0 = vld [vmem:[%s789_s3 + $0x40] sm:$0xff] }
  0x12   :  { %v44_v1 = vld [vmem:[%s791_s2] sm:$0x3]  ;;  %v577_v38 = vpop.eup %576 }
  0x13   :  { %307 = vmatpush.bf16.msra.mxu2 %v556_v46  ;;  %v45_v2 = vunpack.c.l.bf16 %v44_v1  ;;  %v205_v21 = vld [vmem:[%s792_s4] sm:$0x1]  ;;  %v343_v39 = vmul.f32 128.0, %v577_v38  ;;  %vm347_vm0 = vweird.f32 %v577_v38 }
  0x14   :  { %143 = vmatpush.bf16.msra.mxu0 %v434_v32  ;;  %321 = vmatpush.bf16.msra.mxu3 %v564_v47  ;;  %v206_v22 = vunpack.c.l.bf16 %v205_v21  ;;  %v26_v24 = vld [vmem:[%s790_s0] sm:$0xff]  }
  0x15   :  { %157 = vmatpush.bf16.msra.mxu1 %v438_v33  ;;  %v47_v3 = vperm.slane %v45_v2, 0  ;;  %v48_v5 = vperm.slane %v45_v2, 2  ;;  %v332_v28 = vunpack.c.l.bf16 %v26_v24  ;;  %v333_v33 = vunpack.c.h.bf16 %v26_v24 }
  0x16   :  { %v207_v23 = vperm.slane %v206_v22, 0 }
  0x17   :  { %308 = vmatpush.bf16.msra.mxu2 %v555_v57  ;;  %v51_v7 = vperm.slane %v47_v3, 0  ;;  %v52_v8 = vperm.slane %v48_v5, 0 }
  0x18   :  { %144 = vmatpush.bf16.msra.mxu0 %v426_v40  ;;  %322 = vmatpush.bf16.msra.mxu3 %v563_v58  ;;  %v344_v40 = vsub.f32 1.0, %v343_v39 }
  0x19   :  { %158 = vmatpush.bf16.msra.mxu1 %v430_v41 }
  0x1a   :  { %v345_v41 = vmul.f32 %v577_v38, %v344_v40 }
  0x1b   :  { %309 = vmatpush.bf16.msra.mxu2 %v554_v59 }
  0x1c   :  { %145 = vmatpush.bf16.msra.mxu0 %v418_v48  ;;  %323 = vmatpush.bf16.msra.mxu3 %v562_v60  ;;  %v346_v42 = vadd.f32 %v577_v38, %v345_v41 }
  0x1d   :  { %159 = vmatpush.bf16.msra.mxu1 %v422_v49 }
  0x1e   :  { %v348_v43 = vsel %vm347_vm0, %v577_v38, %v346_v42 }
  0x1f   :  { %310 = vmatpush.bf16.msra.mxu2 %v553_v61 }
  0x20   :  { %146 = vmatpush.bf16.msra.mxu0 %v410_v54  ;;  %324 = vmatpush.bf16.msra.mxu3 %v561_v62 }
  0x21   :  { %160 = vmatpush.bf16.msra.mxu1 %v414_v55 }
  0x23   :  { %147 = vmatmul.bf16.vlgmr.msra.gmra.mxu0 %v535_v56  ;;  %311 = vmatpush.bf16.msra.mxu2 %v552_v63 }
  0x24   :  { %161 = vmatmul.bf16.vlgmr.msra.gmra.mxu1 %v535_v56  ;;  %325 = vmatpush.bf16.msra.mxu3 %v560_v0 }
  0xa0   :  { %v148_v4 = vpop.f32.mrf.mxu0 }
  0xa1   :  { %v162_v6 = vpop.f32.mrf.mxu1  ;;  %v149_v9 = vadd.f32 %v148_v4, %v51_v7 }
  0xa2   :  { %v163_v10 = vadd.f32 %v162_v6, %v52_v8  ;;  %v574_v6 = vld [vmem:[%s793_s5] ss:$0 sm:$0xff] }
  0xa3   :  { %v167_v15 = vmax.f32 %v149_v9, 0.0 }
  0xa4   :  { %v168_v17 = vmax.f32 %v163_v10, 0.0  ;;  %v575_v10 = vld [vmem:[%s794_s6] ss:$0 sm:$0xff] }
  0xa8   :  { %v150_v11 = vpop.f32.mrf.mxu0 }
  0xa9   :  { %v151_v12 = vadd.f32 %v150_v11, %v51_v7  ;;  %v164_v13 = vpop.f32.mrf.mxu1 }
  0xaa   :  { %v165_v14 = vadd.f32 %v164_v13, %v52_v8 }
  0xab   :  { %v169_v16 = vmax.f32 %v151_v12, 0.0 }
  0xac   :  { %v170_v18 = vmax.f32 %v165_v14, 0.0 }
  0xad   :  { %v171_v19 = vpack.c.bf16 %v169_v16, %v167_v15 }
  0xae   :  { %v172_v20 = vpack.c.bf16 %v170_v18, %v168_v17 }
  0xaf   :  { %312 = vmatmul.bf16.vlgmr.msra.gmra.mxu2 %v171_v19 }
  0xb0   :  { %326 = vmatmul.bf16.vlgmr.msra.gmra.mxu3 %v172_v20 }
 0x132   :  { %v313_v25 = vpop.f32.mrf.mxu2 }
 0x133   :  { %v314_v26 = vadd.f32 %v313_v25, %v207_v23  ;;  %v327_v27 = vpop.f32.mrf.mxu3 }
 0x135   :  { %v328_v29 = vadd.f32 %v327_v27, %v314_v26 }
 0x137   :  { %v334_v30 = vadd.f32 %v332_v28, %v328_v29 }
 0x139   :  { %338 = vadd.xlane.f32.xlu0 %v334_v30 }
 0x13a   :  { %v315_v31 = vpop.f32.mrf.mxu2 }
 0x13b   :  { %v316_v32 = vadd.f32 %v315_v31, %v207_v23  ;;  %v329_v34 = vpop.f32.mrf.mxu3 }
 0x13d   :  { %v330_v35 = vadd.f32 %v329_v34, %v316_v32 }
 0x13f   :  { %v335_v36 = vadd.f32 %v333_v33, %v330_v35 }
 0x141   :  { %340 = vadd.xlane.f32.xlu0 %v335_v36 }
 0x1ac   :  { %v339_v44 = vpop.xlane.xlu0 %338 }
 0x1ad   :  { %v349_v45 = vmul.f32 %v348_v43, %v339_v44 }
 0x1af   :  { %v351_v46 = vsub.f32 %v334_v30, %v349_v45 }
 0x1b1   :  { %v353_v47 = vmul.f32 %v351_v46, %v351_v46 }
 0x1b3   :  { %355 = vadd.xlane.f32.xlu1 %v353_v47 }
 0x1b4   :  { %v341_v48 = vpop.xlane.xlu0 %340 }
 0x1b5   :  { %v350_v49 = vmul.f32 %v348_v43, %v341_v48 }
 0x1b7   :  { %v352_v50 = vsub.f32 %v335_v36, %v350_v49 }
 0x1b9   :  { %v354_v51 = vmul.f32 %v352_v50, %v352_v50 }
 0x1bb   :  { %357 = vadd.xlane.f32.xlu1 %v354_v51 }
 0x226   :  { %v356_v52 = vpop.xlane.xlu1 %355 }
 0x227   :  { %v359_v53 = vmul.f32 %v356_v52, %v348_v43 }
 0x229   :  { %v361_v54 = vadd.f32 1e-05, %v359_v53 }
 0x22b   :  { %578 = vrsqrt.f32 %v361_v54  ;;  %vm369_vm2 = vweird.f32 %v361_v54 }
 0x22e   :  { %v358_v55 = vpop.xlane.xlu1 %357 }
 0x22f   :  { %v360_v56 = vmul.f32 %v358_v55, %v348_v43 }
 0x231   :  { %v579_v57 = vpop.eup %578  ;;  %v362_v58 = vadd.f32 1e-05, %v360_v56 }
 0x232   :  { %v364_v59 = vmul.f32 %v579_v57, %v361_v54  ;;  %vm370_vm1 = vweird.f32 %v579_v57 }
 0x233   :  { %580 = vrsqrt.f32 %v362_v58  ;;  %vm371_vm3 = vmor %vm369_vm2, %vm370_vm1  ;;  %vm379_vm5 = vweird.f32 %v362_v58 }
 0x234   :  { %v365_v60 = vmul.f32 %v579_v57, %v364_v59 }
 0x236   :  { %v366_v61 = vmul.f32 0.5, %v365_v60 }
 0x238   :  { %v367_v62 = vsub.f32 1.5, %v366_v61 }
 0x239   :  { %v581_v63 = vpop.eup %580 }
 0x23a   :  { %v368_v0 = vmul.f32 %v579_v57, %v367_v62  ;;  %v374_v1 = vmul.f32 %v581_v63, %v362_v58  ;;  %vm380_vm4 = vweird.f32 %v581_v63 }
 0x23b   :  { %vm381_vm6 = vmor %vm379_vm5, %vm380_vm4 }
 0x23c   :  { %v375_v2 = vmul.f32 %v581_v63, %v374_v1  ;;  %v372_v3 = vsel %vm371_vm3, %v579_v57, %v368_v0 }
 0x23d   :  { %v383_v7 = vmul.f32 %v372_v3, %v351_v46 }
 0x23e   :  { %v376_v4 = vmul.f32 0.5, %v375_v2 }
 0x23f   :  { %v388_v11 = vmul.f32 %v574_v6, %v383_v7 }
 0x240   :  { %v377_v5 = vsub.f32 1.5, %v376_v4 }
 0x241   :  { %v393_v14 = vadd.f32 %v575_v10, %v388_v11 }
 0x242   :  { %v378_v8 = vmul.f32 %v581_v63, %v377_v5 }
 0x244   :  { %v382_v9 = vsel %vm381_vm6, %v581_v63, %v378_v8 }
 0x245   :  { %v384_v12 = vmul.f32 %v382_v9, %v352_v50 }
 0x247   :  { %v389_v13 = vmul.f32 %v574_v6, %v384_v12 }
 0x249   :  { %v394_v15 = vadd.f32 %v575_v10, %v389_v13 }
 0x24b   :  { %v571_v16 = vpack.c.bf16 %v394_v15, %v393_v14 }
 0x24d   :  { %572 = vst [vmem:[%s795_s7] sm:$0xff] %v571_v16  }

// kernel: decoder_layer.3
= control target key start
LH: loop header
LB: loop body
LE: loop exit
PB: predicated region body
PF: predicated region fallthrough
CT: control target
= control target key end

     0   :  { %s1522_s25 = smov 0   ;;  %s1524_s26 = smov 0   ;;  %s1706_s0 = inlined_call_operand.vmem [shape: bf16[2,8,128], index: 0, kind: input, shape index: {}, may-alias: {0,1}]   ;;  %s1707_s1 = inlined_call_operand.vmem [shape: bf16[2,8,128], index: 1, kind: input, shape index: {}, may-alias: {0,1}]   ;;  %s1708_s2 = inlined_call_operand.vmem [shape: f32[2,8,8], index: 2, kind: input, shape index: {}]   ;;  %s1709_s3 = inlined_call_operand.vmem [shape: bf16[2,128,64], index: 3, kind: input, shape index: {}]   ;;  %s1710_s4 = inlined_call_operand.vmem [shape: bf16[2,1,64], index: 4, kind: input, shape index: {}]   ;;  %s1711_s5 = inlined_call_operand.vmem [shape: bf16[2,128,64], index: 5, kind: input, shape index: {}]   ;;  %s1712_s6 = inlined_call_operand.vmem [shape: bf16[2,1,64], index: 6, kind: input, shape index: {}]   ;;  %s1713_s7 = inlined_call_operand.vmem [shape: bf16[2,128,64], index: 7, kind: input, shape index: {}]   ;;  %s1714_s8 = inlined_call_operand.vmem [shape: bf16[2,1,64], index: 8, kind: input, shape index: {}]   ;;  %s1715_s9 = inlined_call_operand.vmem [shape: bf16[2,64,128], index: 9, kind: input, shape index: {}]   ;;  %s1716_s10 = inlined_call_operand.vmem [shape: bf16[1,128], index: 10, kind: input, shape index: {}]   ;;  %s1717_s11 = inlined_call_operand.vmem [shape: f32[1,128], index: 11, kind: input, shape index: {}]   ;;  %s1718_s12 = inlined_call_operand.vmem [shape: f32[1,128], index: 12, kind: input, shape index: {}]   ;;  %s1719_s13 = inlined_call_operand.vmem [shape: bf16[2,8,128], index: 13, kind: output, shape index: {}]  }
   0x1   :  { %1723 = sst [smem:[#allocation8_spill]] %s1708_s2  ;;  %s1526_s27 = smov 0  }
   0x2   :  { %1724 = sst [smem:[#allocation9_spill]] %s1709_s3  ;;  %s1528_s28 = smov 0  }
   0x3   :  { %1725 = sst [smem:[#allocation10_spill]] %s1711_s5  ;;  %s1530_s29 = smov 0  }
   0x4   :  { %1726 = sst [smem:[#allocation11_spill]] %s1716_s10 }
   0x5   :  { %1727 = sst [smem:[#allocation12_spill]] %s1717_s11 }
   0x6   :  { %1728 = sst [smem:[#allocation13_spill]] %s1718_s12 }
   0x7 LB: > { %1729 = sst [smem:[#allocation3_spill]] %s1440_s27  ;;  %s32_s30 = sadd.s32 1, %s1440_s27  ;;  %s1448_s29 = sphi %s1530_s29, %s23_s29   ;;  %s1444_s28 = sphi %s1528_s28, %s1747_s28   ;;  %s1440_s27 = sphi %s1526_s27, %s1746_s27   ;;  %s1436_s26 = sphi %s1524_s26, %s1745_s26   ;;  %s1432_s25 = sphi %s1522_s25, %s1744_s25  }
   0x8   : > { %1730 = sst [smem:[#allocation4_spill]] %s1444_s28  ;;  %s35_s14 = sadd.s32 1, %s1444_s28 }
   0x9   : > { %1731 = sst [smem:[#allocation5_spill]] %s1448_s29  ;;  %p33_p0 = scmp.ge.s32.totalorder %s32_s30, 2 }
   0xa   : > { %p1194_p1 = scmp.ge.s32.totalorder %s1448_s29, 1  ;;  %p480_p2 = scmp.lt.s32.totalorder %s1448_s29, 5 }
   0xb   : > { %s1749_s30 = smov (%p33_p0, %s32_s30), 0  ;;  %s1751_s14 = smov (!%p33_p0, %s35_s14), %s1444_s28 }
   0xc   : > { %1732 = sst [smem:[#allocation6_spill]] %s1749_s30  ;;  %p481_p3 = pnand %p1194_p1, %p480_p2 }
   0xd   : > { %p37_p4 = scmp.ge.s32.totalorder %s1751_s14, 2  ;;  %p559_p5 = scmp.lt.s32.totalorder (!%p481_p3), %s1436_s26, 1 }
   0xe   : > { %484 = sbr.rel (%p481_p3) target bundleno = 1156 (0x484), region = 72  ;;  %p571_p6 = scmp.lt.s32.totalorder (!%p481_p3), %s1432_s25, 1 }
   0xf   : > { %s1753_s14 = smov (%p37_p4, %s1751_s14), 0  ;;  %s1734_s2 = sld [smem:[#allocation8_spill]] (!%p481_p3) }
  0x10   : > { %1733 = sst [smem:[#allocation7_spill]] %s1753_s14  ;;  %p1207_p7 = scmp.ne.s32.totalorder (!%p481_p3), %s1432_s25, 0 }
  0x11   : > { %s1735_s3 = sld [smem:[#allocation9_spill]] (!%p481_p3) }
  0x12   : > { %s1736_s5 = sld [smem:[#allocation10_spill]] (!%p481_p3) }
  0x13   : > { %s1755_s26 = smov (!%p559_p5, %s1436_s26), 1 }
  0x14   : > { %s1556_s15 = scalar_select %p571_p6, %s1432_s25, 1 }
  0x15   : > { %s1558_s16 = sshll.u32 %s1755_s26, 2  ;;  %s1197_s17 = sshll.u32 %s1755_s26, 3 }
  0x16   : > { %s1571_s30 = scalar_lea.vmem %s1734_s2, %s1197_s17  ;;  %s1326_s28 = sshll.u32 %s1556_s15, 6 }
  0x17   : > { %s1577_s12 = scalar_lea.vmem %s1735_s3, %s1326_s28  ;;  %s586_s14 = scalar_lea.vmem %s1712_s6, %s1556_s15 }
  0x18   : > { %s1586_s21 = scalar_lea.vmem %s1736_s5, %s1326_s28  ;;  %s1595_s2 = scalar_lea.vmem %s1713_s7, %s1326_s28 }
  0x19   : > { %s594_s3 = scalar_lea.vmem %s1714_s8, %s1556_s15  ;;  %s1329_s11 = sshll.u32 %s1556_s15, 5 }
  0x1a   : > { %s603_s20 = scalar_lea.vmem %s1719_s13, %s1558_s16  ;;  %s1609_s10 = scalar_lea.vmem %s1715_s9, %s1329_s11 }
  0x1b   : > { %608 = sbr.rel (%p1207_p7) target bundleno = 34 (0x22), region = 76 }
  0x20   : > { %v1450_v0 = vmov 0.0  }
  0x21   : > { %609 = vst [vmem:[#allocation2] sm:$0xff] %v1450_v0 }
  0x22 PF: > { %v1337_v1 = vld [vmem:[%s1577_s12 + $0x38] sm:$0xff]  ;;  %v1336_v3 = vld [vmem:[%s1577_s12 + $0x30] sm:$0xff]  ;;  %v1335_v5 = vld [vmem:[%s1577_s12 + $0x28] sm:$0xff]  ;;  %s1737_s23 = scalar_lea.vmem %s1706_s0, %s1558_s16  ;;  %s1738_s17 = scalar_lea.vmem %s1707_s1, %s1558_s16  ;;  %vm855_vm0 = vcmask 523264   ;;  %vm878_vm2 = vcmask 64512   ;;  %vm908_vm3 = vcmask 1043456  }
  0x23   : > { %v1345_v2 = vld [vmem:[%s1586_s21 + $0x38] sm:$0xff]  ;;  %679 = vmatpush.bf16.msra.mxu0 %v1337_v1  ;;  %v1344_v4 = vld [vmem:[%s1586_s21 + $0x30] sm:$0xff]  ;;  %v1343_v6 = vld [vmem:[%s1586_s21 + $0x28] sm:$0xff]  ;;  %p1323_p8 = scmp.ne.s32.totalorder %s1432_s25, 1 }
  0x24   : > { %760 = vmatpush.bf16.msra.mxu1 %v1345_v2  ;;  %v1334_v7 = vld [vmem:[%s1577_s12 + $0x20] sm:$0xff]  ;;  %v1333_v9 = vld [vmem:[%s1577_s12 + $0x18] sm:$0xff]  ;;  %v1332_v11 = vld [vmem:[%s1577_s12 + $0x10] sm:$0xff]  ;;  %s1741_s11 = sld [smem:[#allocation12_spill]] (!%p1323_p8) }
  0x25   : > { %v1342_v8 = vld [vmem:[%s1586_s21 + $0x20] sm:$0xff]  ;;  %v1341_v10 = vld [vmem:[%s1586_s21 + $0x18] sm:$0xff]  ;;  %v1340_v12 = vld [vmem:[%s1586_s21 + $0x10] sm:$0xff]  ;;  %s1742_s5 = sld [smem:[#allocation13_spill]] (!%p1323_p8) }
  0x26   : > { %v1331_v13 = vld [vmem:[%s1577_s12 + $0x8] sm:$0xff]  ;;  %v1330_v15 = vld [vmem:[%s1577_s12] sm:$0xff]  ;;  %s1739_s12 = scalar_lea.vmem %s1710_s4, %s1556_s15  ;;  %v1353_v35 = vld [vmem:[%s1595_s2 + $0x38] sm:$0xff] }
  0x27   : > { %680 = vmatpush.bf16.msra.mxu0 %v1336_v3  ;;  %v1339_v14 = vld [vmem:[%s1586_s21 + $0x8] sm:$0xff]  ;;  %v1338_v16 = vld [vmem:[%s1586_s21] sm:$0xff]  ;;  %840 = vmatpush.bf16.msra.mxu2 %v1353_v35  ;;  %v1352_v36 = vld [vmem:[%s1595_s2 + $0x30] sm:$0xff] }
  0x28   : > { %761 = vmatpush.bf16.msra.mxu1 %v1344_v4  ;;  %v1633_v17 = vld [vmem:[%s1737_s23] sm:$0xf]  ;;  %v1351_v37 = vld [vmem:[%s1595_s2 + $0x28] sm:$0xff]  ;;  %v1349_v39 = vld [vmem:[%s1595_s2 + $0x18] sm:$0xff] }
  0x29   : > { %v611_v18 = vld [vmem:[%s1738_s17] sm:$0xf]  ;;  %v1348_v40 = vld [vmem:[%s1595_s2 + $0x10] sm:$0xff]  ;;  %v1347_v42 = vld [vmem:[%s1595_s2 + $0x8] sm:$0xff] }
  0x2a   : > { %v628_v19 = vld [vmem:[%s1739_s12] sm:$0x1]  ;;  %v1357_v61 = vld [vmem:[%s1609_s10 + $0x18] sm:$0xff]  ;;  %v1356_v62 = vld [vmem:[%s1609_s10 + $0x10] sm:$0xff] }
  0x2b   : > { %681 = vmatpush.bf16.msra.mxu0 %v1335_v5  ;;  %v709_v20 = vld [vmem:[%s586_s14] sm:$0x1]  ;;  %v629_v21 = vunpack.c.l.bf16 %v628_v19  ;;  %841 = vmatpush.bf16.msra.mxu2 %v1352_v36  ;;  %v1355_v63 = vld [vmem:[%s1609_s10 + $0x8] sm:$0xff] }
  0x2c   : > { %762 = vmatpush.bf16.msra.mxu1 %v1343_v6  ;;  %v710_v22 = vunpack.c.l.bf16 %v709_v20  ;;  %v1350_v38 = vld [vmem:[%s1595_s2 + $0x20] sm:$0xff] }
  0x2d   : > { %v630_v23 = vperm.slane %v629_v21, 0  ;;  %v875_v41 = vld [vmem:[%s1571_s30] sm:$0xff] }
  0x2e   : > { %v711_v24 = vperm.slane %v710_v22, 0  ;;  %vm876_vm1 = vcmp.eq.f32.partialorder %v875_v41, 0.0  ;;  %v1346_v46 = vld [vmem:[%s1595_s2] sm:$0xff] }
  0x2f   : > { %682 = vmatpush.bf16.msra.mxu0 %v1334_v7  ;;  %842 = vmatpush.bf16.msra.mxu2 %v1351_v37  ;;  %v789_v55 = vld [vmem:[%s594_s3] sm:$0x1] }
  0x30   : > { %763 = vmatpush.bf16.msra.mxu1 %v1342_v8  ;;  %v790_v56 = vunpack.c.l.bf16 %v789_v55  ;;  %v1354_v1 = vld [vmem:[%s1609_s10] sm:$0xff]  ;;  %s1740_s10 = sld [smem:[#allocation11_spill]] (!%p1323_p8) }
  0x32   : > { %v791_v57 = vperm.slane %v790_v56, 0 }
  0x33   : > { %683 = vmatpush.bf16.msra.mxu0 %v1333_v9  ;;  %843 = vmatpush.bf16.msra.mxu2 %v1350_v38 }
  0x34   : > { %764 = vmatpush.bf16.msra.mxu1 %v1341_v10 }
  0x37   : > { %684 = vmatpush.bf16.msra.mxu0 %v1332_v11  ;;  %844 = vmatpush.bf16.msra.mxu2 %v1349_v39 }
  0x38   : > { %765 = vmatpush.bf16.msra.mxu1 %v1340_v12 }
  0x3b   : > { %685 = vmatpush.bf16.msra.mxu0 %v1331_v13  ;;  %845 = vmatpush.bf16.msra.mxu2 %v1348_v40 }
  0x3c   : > { %766 = vmatpush.bf16.msra.mxu1 %v1339_v14 }
  0x3f   : > { %686 = vmatpush.bf16.msra.mxu0 %v1330_v15  ;;  %846 = vmatpush.bf16.msra.mxu2 %v1347_v42 }
  0x40   : > { %767 = vmatpush.bf16.msra.mxu1 %v1338_v16 }
  0x42   : > { %687 = vmatmul.bf16.vlgmr.msra.gmra.mxu0 %v1633_v17 }
  0x43   : > { %768 = vmatmul.bf16.vlgmr.msra.gmra.mxu1 %v611_v18  ;;  %847 = vmatpush.bf16.msra.mxu2 %v1346_v46 }
  0x46   : > { %848 = vmatmul.bf16.vlgmr.msra.gmra.mxu2 %v611_v18  ;;  %v925_v18 = vld [vmem:[#allocation2] sm:$0xff] }
  0xbf   : > { %v688_v25 = vpop.f32.mrf.mxu0 }
  0xc0   : > { %v769_v26 = vpop.f32.mrf.mxu1  ;;  %v689_v27 = vadd.f32 %v688_v25, %v630_v23 }
  0xc1   : > { %v770_v28 = vadd.f32 %v769_v26, %v711_v24 }
  0xc2   : > { %v692_v30 = vmul.f32 0.125, %v689_v27 }
  0xc3   : > { %v854_v29 = vpack.c.bf16 %v770_v28, %v770_v28 }
  0xc4   : > { %v853_v34 = vpack.c.bf16 %v692_v30, %v692_v30 }
  0xc5   : > { %v860_v31 = vsel %vm855_vm0, %v854_v29, 0 }
  0xc6   : > { %869 = vmatpush.bf16.xpose.msra.mxu3 %v860_v31 }
  0xc7   : > { %v690_v32 = vpop.f32.mrf.mxu0 }
  0xc8   : > { %v771_v33 = vpop.f32.mrf.mxu1 }
  0xc9   : > { %v849_v53 = vpop.f32.mrf.mxu2 }
  0xca   : > { %v850_v58 = vadd.f32 %v849_v53, %v791_v57 }
  0xcc   : > { %v904_v59 = vpack.c.bf16 %v850_v58, %v850_v58 }
  0xcd   : > { %1304 = vmatmul.msk.bf16.vlgmr.msra.gmra.mxu3 %vm855_vm0, %v853_v34 }
  0xce   : > { %v910_v60 = vsel %vm908_vm3, %v904_v59, 0 }
  0xcf   : > { %919 = vmatpush.bf16.msrb.mxu3 %v910_v60 }
  0xd1   : > { %v851_v54 = vpop.f32.mrf.mxu2 }
  0xd3   : > { %966 = vmatpush.bf16.msra.mxu3 %v1357_v61 }
  0xd7   : > { %967 = vmatpush.bf16.msra.mxu3 %v1356_v62 }
  0xdb   : > { %968 = vmatpush.bf16.msra.mxu3 %v1355_v63 }
  0xdf   : > { %969 = vmatpush.bf16.msra.mxu3 %v1354_v1 }
 0x150   : > { %v871_v43 = vpop.f32.mrf.mxu3 }
 0x151   : > { %v877_v44 = vsel %vm876_vm1, -1e+10, %v871_v43 }
 0x152   : > { %v879_v45 = vsel %vm878_vm2, %v877_v44, -inf }
 0x153   : > { %880 = vmax.xlane.f32.xlu0 %v879_v45 }
 0x158   : > { %v873_v47 = vpop.f32.mrf.mxu3 }
 0x1c6   : > { %v881_v48 = vpop.xlane.xlu0 %880 }
 0x1c7   : > { %v882_v49 = vsub.f32 %v877_v44, %v881_v48 }
 0x1c9   : > { %v883_v50 = vmul.f32 1.442695, %v882_v49 }
 0x1cb   : > { %1400 = vpow2.f32 %v883_v50 }
 0x1d1   : > { %v1401_v51 = vpop.eup %1400 }
 0x1d2   : > { %v885_v52 = vsel %vm878_vm2, %v1401_v51, 0.0 }
 0x1d3   : > { %886 = vadd.xlane.f32.xlu0 %v885_v52 }
 0x246   : > { %v887_v0 = vpop.xlane.xlu0 %886 }
 0x247   : > { %1402 = vrcp.f32 %v887_v0  ;;  %v899_v5 = vand.u32 2147483648, %v887_v0  ;;  %v897_v7 = vand.u32 2147483647, %v887_v0  ;;  %vm893_vm5 = vweird.f32 %v887_v0 }
 0x249   : > { %v900_v9 = vor.u32 1.1754944e-38, %v899_v5  ;;  %vm898_vm7 = vcmp.eq.f32.partialorder %v897_v7, 8.507059e+37 }
 0x24d   : > { %v1403_v2 = vpop.eup %1402 }
 0x24e   : > { %v889_v3 = vmul.f32 %v1403_v2, %v887_v0  ;;  %vm894_vm4 = vweird.f32 %v1403_v2 }
 0x24f   : > { %vm895_vm6 = vmor %vm893_vm5, %vm894_vm4 }
 0x250   : > { %v890_v4 = vsub.f32 1.0, %v889_v3 }
 0x252   : > { %v891_v6 = vmul.f32 %v1403_v2, %v890_v4 }
 0x254   : > { %v892_v8 = vadd.f32 %v1403_v2, %v891_v6 }
 0x256   : > { %v896_v10 = vsel %vm895_vm6, %v1403_v2, %v892_v8 }
 0x257   : > { %v901_v11 = vsel %vm898_vm7, %v900_v9, %v896_v10 }
 0x258   : > { %v902_v12 = vmul.f32 %v1401_v51, %v901_v11 }
 0x25a   : > { %v903_v13 = vpack.c.bf16 %v902_v12, %v902_v12 }
 0x25c   : > { %1305 = vmatmul.msk.bf16.vlgmr.msrb.gmra.mxu3 %vm878_vm2, %v903_v13 }
 0x2df   : > { %v921_v14 = vpop.f32.mrf.mxu3 }
 0x2e0   : > { %v926_v15 = vpack.c.bf16 %v921_v14, %v921_v14 }
 0x2e2   : > { %1322 = vmatmul.msk.bf16.vlgmr.msra.gmra.mxu3 %vm855_vm0, %v926_v15 }
 0x2e7   : > { %v923_v16 = vpop.f32.mrf.mxu3 }
 0x365   : > { %v971_v19 = vpop.f32.mrf.mxu3 }
 0x366   : > { %v975_v20 = vadd.f32 %v971_v19, %v925_v18 }
 0x368   : > { %976 = vst [vmem:[#allocation2] sm:$0xff] %v975_v20 }
 0x369   : > { %980 = sbr.rel (%p1323_p8) target bundleno = 1156 (0x484), region = 80 }
 0x36d   : > { %v973_v21 = vpop.f32.mrf.mxu3 }
 0x36e   : > { %v982_v22 = vld [vmem:[%s1740_s10] sm:$0x1]  ;;  %v986_v26 = vunpack.c.l.bf16 %v1633_v17  ;;  %v1451_v29 = vmov 128.0  }
 0x36f   : > { %v983_v23 = vunpack.c.l.bf16 %v982_v22  ;;  %v981_v24 = vld [vmem:[#allocation2] sm:$0xff]  ;;  %1406 = vrcp.f32 %v1451_v29 }
 0x370   : > { %v1404_v48 = vld [vmem:[%s1741_s11] ss:$0 sm:$0xff] }
 0x371   : > { %v984_v25 = vperm.slane %v983_v23, 0  ;;  %v1405_v50 = vld [vmem:[%s1742_s5] ss:$0 sm:$0xff] }
 0x373   : > { %v985_v27 = vadd.f32 %v984_v25, %v981_v24 }
 0x375   : > { %v987_v28 = vadd.f32 %v986_v26, %v985_v27  ;;  %v1407_v30 = vpop.eup %1406 }
 0x376   : > { %v993_v31 = vmul.f32 128.0, %v1407_v30  ;;  %vm997_vm8 = vweird.f32 %v1407_v30 }
 0x377   : > { %990 = vadd.xlane.f32.xlu0 %v987_v28 }
 0x378   : > { %v994_v32 = vsub.f32 1.0, %v993_v31 }
 0x37a   : > { %v995_v33 = vmul.f32 %v1407_v30, %v994_v32 }
 0x37c   : > { %v996_v34 = vadd.f32 %v1407_v30, %v995_v33 }
 0x37e   : > { %v998_v35 = vsel %vm997_vm8, %v1407_v30, %v996_v34 }
 0x3ea   : > { %v991_v36 = vpop.xlane.xlu0 %990 }
 0x3eb   : > { %v999_v37 = vmul.f32 %v998_v35, %v991_v36 }
 0x3ed   : > { %v1000_v38 = vsub.f32 %v987_v28, %v999_v37 }
 0x3ef   : > { %v1001_v39 = vmul.f32 %v1000_v38, %v1000_v38 }
 0x3f1   : > { %1002 = vadd.xlane.f32.xlu0 %v1001_v39 }
 0x464   : > { %v1003_v40 = vpop.xlane.xlu0 %1002 }
 0x465   : > { %v1004_v41 = vmul.f32 %v1003_v40, %v998_v35 }
 0x467   : > { %v1005_v17 = vadd.f32 1e-05, %v1004_v41 }
 0x469   : > { %1408 = vrsqrt.f32 %v1005_v17  ;;  %vm1012_vm10 = vweird.f32 %v1005_v17 }
 0x46f   : > { %v1409_v42 = vpop.eup %1408 }
 0x470   : > { %v1007_v43 = vmul.f32 %v1409_v42, %v1005_v17  ;;  %vm1013_vm9 = vweird.f32 %v1409_v42 }
 0x471   : > { %vm1014_vm11 = vmor %vm1012_vm10, %vm1013_vm9 }
 0x472   : > { %v1008_v44 = vmul.f32 %v1409_v42, %v1007_v43 }
 0x474   : > { %v1009_v45 = vmul.f32 0.5, %v1008_v44 }
 0x476   : > { %v1010_v46 = vsub.f32 1.5, %v1009_v45 }
 0x478   : > { %v1011_v47 = vmul.f32 %v1409_v42, %v1010_v46 }
 0x47a   : > { %v1015_v49 = vsel %vm1014_vm11, %v1409_v42, %v1011_v47 }
 0x47b   : > { %v1016_v51 = vmul.f32 %v1015_v49, %v1000_v38 }
 0x47d   : > { %v1020_v52 = vmul.f32 %v1404_v48, %v1016_v51 }
 0x47f   : > { %v1024_v53 = vadd.f32 %v1405_v50, %v1020_v52 }
 0x481   : > { %v1025_v54 = vpack.c.bf16 %v1024_v53, %v1024_v53 }
 0x483   : > { %1026 = vst [vmem:[%s603_s20] sm:$0xf] %v1025_v54 }
 0x484 PF: > { %s1743_s18 = sld [smem:[#allocation5_spill]] }
 0x485   : > { %s1744_s25 = sld [smem:[#allocation3_spill]] }
 0x486   : > { %s1745_s26 = sld [smem:[#allocation4_spill]] }
 0x487   : > { %s1746_s27 = sld [smem:[#allocation6_spill]] }
 0x488   : > { %s1747_s28 = sld [smem:[#allocation7_spill]] }
 0x48a   : > { %s23_s29 = sadd.s32 1, %s1743_s18  }
 0x48b   : > { %p20_p9 = scmp.ge.s32.totalorder %s23_s29, 6  }
 0x48d   :  { %22 = sbr.rel (!%p20_p9) target bundleno = 7 (0x7), region = 137 }

// kernel: decoder_layer.4
= control target key start
LH: loop header
LB: loop body
LE: loop exit
PB: predicated region body
PF: predicated region fallthrough
CT: control target
= control target key end

     0   :  { %s1535_s25 = smov 0   ;;  %s1537_s26 = smov 0   ;;  %s1715_s0 = inlined_call_operand.vmem [shape: bf16[2,8,128], index: 0, kind: input, shape index: {}]   ;;  %s1716_s1 = inlined_call_operand.vmem [shape: bf16[2,16,128], index: 1, kind: input, shape index: {}]   ;;  %s1717_s2 = inlined_call_operand.vmem [shape: f32[2,1,16], index: 2, kind: input, shape index: {}]   ;;  %s1718_s3 = inlined_call_operand.vmem [shape: bf16[2,128,64], index: 3, kind: input, shape index: {}]   ;;  %s1719_s4 = inlined_call_operand.vmem [shape: bf16[2,1,64], index: 4, kind: input, shape index: {}]   ;;  %s1720_s5 = inlined_call_operand.vmem [shape: bf16[2,128,64], index: 5, kind: input, shape index: {}]   ;;  %s1721_s6 = inlined_call_operand.vmem [shape: bf16[2,1,64], index: 6, kind: input, shape index: {}]   ;;  %s1722_s7 = inlined_call_operand.vmem [shape: bf16[2,128,64], index: 7, kind: input, shape index: {}]   ;;  %s1723_s8 = inlined_call_operand.vmem [shape: bf16[2,1,64], index: 8, kind: input, shape index: {}]   ;;  %s1724_s9 = inlined_call_operand.vmem [shape: bf16[2,64,128], index: 9, kind: input, shape index: {}]   ;;  %s1725_s10 = inlined_call_operand.vmem [shape: bf16[1,128], index: 10, kind: input, shape index: {}]   ;;  %s1726_s11 = inlined_call_operand.vmem [shape: f32[1,128], index: 11, kind: input, shape index: {}]   ;;  %s1727_s12 = inlined_call_operand.vmem [shape: f32[1,128], index: 12, kind: input, shape index: {}]   ;;  %s1728_s13 = inlined_call_operand.vmem [shape: bf16[2,8,128], index: 13, kind: output, shape index: {}]  }
   0x1   :  { %1732 = sst [smem:[#allocation8_spill]] %s1715_s0  ;;  %s1539_s27 = smov 0  }
   0x2   :  { %1733 = sst [smem:[#allocation9_spill]] %s1716_s1  ;;  %s1541_s28 = smov 0  }
   0x3   :  { %1734 = sst [smem:[#allocation10_spill]] %s1718_s3  ;;  %s1543_s29 = smov 0  }
   0x4   :  { %1735 = sst [smem:[#allocation11_spill]] %s1720_s5 }
   0x5   :  { %1736 = sst [smem:[#allocation12_spill]] %s1725_s10 }
   0x6   :  { %1737 = sst [smem:[#allocation13_spill]] %s1726_s11 }
   0x7   :  { %1738 = sst [smem:[#allocation14_spill]] %s1727_s12 }
   0x8 LB: > { %1739 = sst [smem:[#allocation3_spill]] %s1452_s27  ;;  %s32_s30 = sadd.s32 1, %s1452_s27  ;;  %s1460_s29 = sphi %s1543_s29, %s23_s29   ;;  %s1456_s28 = sphi %s1541_s28, %s1757_s28   ;;  %s1452_s27 = sphi %s1539_s27, %s1756_s27   ;;  %s1448_s26 = sphi %s1537_s26, %s1755_s26   ;;  %s1444_s25 = sphi %s1535_s25, %s1754_s25  }
   0x9   : > { %1740 = sst [smem:[#allocation4_spill]] %s1456_s28  ;;  %s35_s14 = sadd.s32 1, %s1456_s28 }
   0xa   : > { %1741 = sst [smem:[#allocation5_spill]] %s1460_s29  ;;  %p33_p0 = scmp.ge.s32.totalorder %s32_s30, 2 }
   0xb   : > { %p1199_p1 = scmp.ge.s32.totalorder %s1460_s29, 1  ;;  %p480_p2 = scmp.lt.s32.totalorder %s1460_s29, 5 }
   0xc   : > { %s1759_s30 = smov (%p33_p0, %s32_s30), 0  ;;  %s1761_s14 = smov (!%p33_p0, %s35_s14), %s1456_s28 }
   0xd   : > { %1742 = sst [smem:[#allocation6_spill]] %s1759_s30  ;;  %p481_p3 = pnand %p1199_p1, %p480_p2 }
   0xe   : > { %p37_p4 = scmp.ge.s32.totalorder %s1761_s14, 2  ;;  %p559_p5 = scmp.lt.s32.totalorder (!%p481_p3), %s1448_s26, 1 }
   0xf   : > { %484 = sbr.rel (%p481_p3) target bundleno = 1164 (0x48c), region = 72  ;;  %p571_p6 = scmp.lt.s32.totalorder (!%p481_p3), %s1444_s25, 1 }
  0x10   : > { %s1763_s14 = smov (%p37_p4, %s1761_s14), 0  ;;  %s1744_s0 = sld [smem:[#allocation8_spill]] (!%p481_p3) }
  0x11   : > { %1743 = sst [smem:[#allocation7_spill]] %s1763_s14  ;;  %p1212_p7 = scmp.ne.s32.totalorder (!%p481_p3), %s1444_s25, 0 }
  0x12   : > { %s1745_s1 = sld [smem:[#allocation9_spill]] (!%p481_p3) }
  0x13   : > { %s1746_s3 = sld [smem:[#allocation10_spill]] (!%p481_p3) }
  0x14   : > { %s1765_s26 = smov (!%p559_p5, %s1448_s26), 1  ;;  %s1747_s5 = sld [smem:[#allocation11_spill]] }
  0x15   : > { %s1571_s15 = scalar_select %p571_p6, %s1444_s25, 1 }
  0x16   : > { %s1200_s16 = sshll.u32 %s1765_s26, 2  ;;  %s1335_s17 = sshll.u32 %s1765_s26, 3 }
  0x17   : > { %s1578_s20 = scalar_lea.vmem %s1744_s0, %s1200_s16  ;;  %s1336_s28 = sshll.u32 %s1571_s15, 6 }
  0x18   : > { %s1583_s23 = scalar_lea.vmem %s1745_s1, %s1335_s17  ;;  %s586_s14 = scalar_lea.vmem %s1721_s6, %s1571_s15 }
  0x19   : > { %s1593_s12 = scalar_lea.vmem %s1746_s3, %s1336_s28  ;;  %s1611_s1 = scalar_lea.vmem %s1722_s7, %s1336_s28 }
  0x1a   : > { %s1602_s21 = scalar_lea.vmem %s1747_s5, %s1336_s28  ;;  %s594_s3 = scalar_lea.vmem %s1723_s8, %s1571_s15 }
  0x1b   : > { %s1339_s10 = sshll.u32 %s1571_s15, 5  ;;  %s1621_s0 = scalar_lea.vmem %s1728_s13, %s1200_s16 }
  0x1c   : > { %s1626_s17 = scalar_lea.vmem %s1724_s9, %s1339_s10  ;;  %608 = sbr.rel (%p1212_p7) target bundleno = 35 (0x23), region = 76 }
  0x21   : > { %v1462_v0 = vmov 0.0  }
  0x22   : > { %609 = vst [vmem:[#allocation2] sm:$0xff] %v1462_v0 }
  0x23 PF: > { %v1356_v1 = vld [vmem:[%s1602_s21 + $0x38] sm:$0xff]  ;;  %v1355_v3 = vld [vmem:[%s1602_s21 + $0x30] sm:$0xff]  ;;  %v1354_v5 = vld [vmem:[%s1602_s21 + $0x28] sm:$0xff]  ;;  %s1748_s18 = scalar_lea.vmem %s1719_s4, %s1571_s15  ;;  %vm864_vm0 = vcmask 523264   ;;  %v1463_v42 = vmov 0   ;;  %vm890_vm3 = vcmask 130048  }
  0x24   : > { %v1348_v2 = vld [vmem:[%s1593_s12 + $0x38] sm:$0xff]  ;;  %767 = vmatpush.bf16.msra.mxu1 %v1356_v1  ;;  %v1347_v4 = vld [vmem:[%s1593_s12 + $0x30] sm:$0xff]  ;;  %v1346_v6 = vld [vmem:[%s1593_s12 + $0x28] sm:$0xff]  ;;  %p1332_p8 = scmp.ne.s32.totalorder %s1444_s25, 1 }
  0x25   : > { %680 = vmatpush.bf16.msra.mxu0 %v1348_v2  ;;  %v1353_v7 = vld [vmem:[%s1602_s21 + $0x20] sm:$0xff]  ;;  %v1352_v9 = vld [vmem:[%s1602_s21 + $0x18] sm:$0xff]  ;;  %v1351_v11 = vld [vmem:[%s1602_s21 + $0x10] sm:$0xff]  ;;  %s1750_s15 = sld [smem:[#allocation12_spill]] (!%p1332_p8) }
  0x26   : > { %v1345_v8 = vld [vmem:[%s1593_s12 + $0x20] sm:$0xff]  ;;  %v1344_v10 = vld [vmem:[%s1593_s12 + $0x18] sm:$0xff]  ;;  %v1343_v12 = vld [vmem:[%s1593_s12 + $0x10] sm:$0xff]  ;;  %s1752_s29 = sld [smem:[#allocation14_spill]] (!%p1332_p8) }
  0x27   : > { %v1350_v13 = vld [vmem:[%s1602_s21 + $0x8] sm:$0xff]  ;;  %v1349_v15 = vld [vmem:[%s1602_s21] sm:$0xff]  ;;  %v1364_v36 = vld [vmem:[%s1611_s1 + $0x38] sm:$0xff] }
  0x28   : > { %768 = vmatpush.bf16.msra.mxu1 %v1355_v3  ;;  %v1342_v14 = vld [vmem:[%s1593_s12 + $0x8] sm:$0xff]  ;;  %v1341_v16 = vld [vmem:[%s1593_s12] sm:$0xff]  ;;  %848 = vmatpush.bf16.msra.mxu2 %v1364_v36  ;;  %v1363_v37 = vld [vmem:[%s1611_s1 + $0x30] sm:$0xff] }
  0x29   : > { %681 = vmatpush.bf16.msra.mxu0 %v1347_v4  ;;  %v1340_v17 = vld [vmem:[%s1583_s23] sm:$0xff]  ;;  %v1362_v38 = vld [vmem:[%s1611_s1 + $0x28] sm:$0xff]  ;;  %s1749_s23 = scalar_lea.vmem %s1717_s2, %s1765_s26  ;;  %v1360_v41 = vld [vmem:[%s1611_s1 + $0x18] sm:$0xff] }
  0x2a   : > { %v1647_v18 = vld [vmem:[%s1578_s20] sm:$0xf]  ;;  %v1359_v45 = vld [vmem:[%s1611_s1 + $0x10] sm:$0xff]  ;;  %v1358_v46 = vld [vmem:[%s1611_s1 + $0x8] sm:$0xff] }
  0x2b   : > { %v710_v19 = vld [vmem:[%s586_s14] sm:$0x1]  ;;  %v1368_v1 = vld [vmem:[%s1626_s17 + $0x18] sm:$0xff]  ;;  %v1367_v2 = vld [vmem:[%s1626_s17 + $0x10] sm:$0xff]  ;;  %s1751_s14 = sld [smem:[#allocation13_spill]] (!%p1332_p8) }
  0x2c   : > { %769 = vmatpush.bf16.msra.mxu1 %v1354_v5  ;;  %v629_v20 = vld [vmem:[%s1748_s18] sm:$0x1]  ;;  %v711_v23 = vunpack.c.l.bf16 %v710_v19  ;;  %849 = vmatpush.bf16.msra.mxu2 %v1363_v37  ;;  %v1366_v3 = vld [vmem:[%s1626_s17 + $0x8] sm:$0xff] }
  0x2d   : > { %682 = vmatpush.bf16.msra.mxu0 %v1346_v6  ;;  %v630_v24 = vunpack.c.l.bf16 %v629_v20  ;;  %v884_v39 = vld [vmem:[%s1749_s23] sm:$0x1] }
  0x2e   : > { %v712_v25 = vperm.slane %v711_v23, 0  ;;  %v1361_v40 = vld [vmem:[%s1611_s1 + $0x20] sm:$0xff]  ;;  %vm885_vm1 = vcmp.eq.f32.partialorder %v884_v39, 0.0 }
  0x2f   : > { %v631_v26 = vperm.slane %v630_v24, 0  ;;  %v886_v43 = vsel %vm885_vm1, 1, %v1463_v42  ;;  %v1357_v50 = vld [vmem:[%s1611_s1] sm:$0xff] }
  0x30   : > { %770 = vmatpush.bf16.msra.mxu1 %v1353_v7  ;;  %850 = vmatpush.bf16.msra.mxu2 %v1362_v38  ;;  %v887_v44 = vperm.slane %v886_v43, 0  ;;  %v797_v57 = vld [vmem:[%s594_s3] sm:$0x1] }
  0x31   : > { %683 = vmatpush.bf16.msra.mxu0 %v1345_v8  ;;  %v798_v58 = vunpack.c.l.bf16 %v797_v57  ;;  %v1365_v5 = vld [vmem:[%s1626_s17] sm:$0xff] }
  0x32   : > { %vm888_vm2 = vcmp.eq.s32.totalorder %v887_v44, 1 }
  0x33   : > { %v799_v60 = vperm.slane %v798_v58, 0 }
  0x34   : > { %771 = vmatpush.bf16.msra.mxu1 %v1352_v9  ;;  %851 = vmatpush.bf16.msra.mxu2 %v1361_v40 }
  0x35   : > { %684 = vmatpush.bf16.msra.mxu0 %v1344_v10 }
  0x38   : > { %772 = vmatpush.bf16.msra.mxu1 %v1351_v11  ;;  %852 = vmatpush.bf16.msra.mxu2 %v1360_v41 }
  0x39   : > { %685 = vmatpush.bf16.msra.mxu0 %v1343_v12 }
  0x3c   : > { %773 = vmatpush.bf16.msra.mxu1 %v1350_v13  ;;  %853 = vmatpush.bf16.msra.mxu2 %v1359_v45 }
  0x3d   : > { %686 = vmatpush.bf16.msra.mxu0 %v1342_v14 }
  0x40   : > { %774 = vmatpush.bf16.msra.mxu1 %v1349_v15  ;;  %854 = vmatpush.bf16.msra.mxu2 %v1358_v46 }
  0x41   : > { %687 = vmatpush.bf16.msra.mxu0 %v1341_v16 }
  0x43   : > { %775 = vmatmul.bf16.vlgmr.msra.gmra.mxu1 %v1340_v17 }
  0x44   : > { %688 = vmatmul.bf16.vlgmr.msra.gmra.mxu0 %v1647_v18  ;;  %855 = vmatpush.bf16.msra.mxu2 %v1357_v50 }
  0x47   : > { %856 = vmatmul.bf16.vlgmr.msra.gmra.mxu2 %v1340_v17 }
  0xc0   : > { %v776_v21 = vpop.f32.mrf.mxu1 }
  0xc1   : > { %v689_v22 = vpop.f32.mrf.mxu0  ;;  %v777_v29 = vadd.f32 %v776_v21, %v712_v25 }
  0xc2   : > { %v690_v30 = vadd.f32 %v689_v22, %v631_v26  ;;  %v933_v22 = vld [vmem:[#allocation2] sm:$0xff] }
  0xc4   : > { %v693_v33 = vmul.f32 0.125, %v690_v30 }
  0xc6   : > { %v862_v35 = vpack.c.bf16 %v693_v33, %v693_v33 }
  0xc8   : > { %v778_v27 = vpop.f32.mrf.mxu1 }
  0xc9   : > { %v691_v28 = vpop.f32.mrf.mxu0  ;;  %v779_v31 = vadd.f32 %v778_v27, %v712_v25 }
  0xca   : > { %v857_v59 = vpop.f32.mrf.mxu2 }
  0xcb   : > { %v863_v32 = vpack.c.bf16 %v779_v31, %v777_v29  ;;  %v858_v61 = vadd.f32 %v857_v59, %v799_v60 }
  0xcd   : > { %v869_v34 = vsel %vm864_vm0, %v863_v32, 0 }
  0xce   : > { %878 = vmatpush.bf16.xpose.msra.mxu3 %v869_v34 }
  0xd2   : > { %v859_v62 = vpop.f32.mrf.mxu2 }
  0xd3   : > { %v860_v63 = vadd.f32 %v859_v62, %v799_v60 }
  0xd5   : > { %1313 = vmatmul.msk.bf16.vlgmr.msra.gmra.mxu3 %vm864_vm0, %v862_v35  ;;  %v916_v0 = vpack.c.bf16 %v860_v63, %v858_v61 }
  0xd7   : > { %927 = vmatpush.bf16.msrb.mxu3 %v916_v0 }
  0xdb   : > { %974 = vmatpush.bf16.msra.mxu3 %v1368_v1 }
  0xdf   : > { %975 = vmatpush.bf16.msra.mxu3 %v1367_v2 }
  0xe3   : > { %976 = vmatpush.bf16.msra.mxu3 %v1366_v3 }
  0xe7   : > { %977 = vmatpush.bf16.msra.mxu3 %v1365_v5 }
 0x158   : > { %v880_v47 = vpop.f32.mrf.mxu3 }
 0x159   : > { %v889_v48 = vsel %vm888_vm2, -1e+10, %v880_v47 }
 0x15a   : > { %v891_v49 = vsel %vm890_vm3, %v889_v48, -inf }
 0x15b   : > { %892 = vmax.xlane.f32.xlu0 %v891_v49 }
 0x160   : > { %v882_v51 = vpop.f32.mrf.mxu3 }
 0x1ce   : > { %v893_v52 = vpop.xlane.xlu0 %892 }
 0x1cf   : > { %v894_v53 = vsub.f32 %v889_v48, %v893_v52 }
 0x1d1   : > { %v895_v54 = vmul.f32 1.442695, %v894_v53 }
 0x1d3   : > { %1412 = vpow2.f32 %v895_v54 }
 0x1d9   : > { %v1413_v55 = vpop.eup %1412 }
 0x1da   : > { %v897_v56 = vsel %vm890_vm3, %v1413_v55, 0.0 }
 0x1db   : > { %898 = vadd.xlane.f32.xlu0 %v897_v56 }
 0x24e   : > { %v899_v4 = vpop.xlane.xlu0 %898 }
 0x24f   : > { %1414 = vrcp.f32 %v899_v4  ;;  %v911_v9 = vand.u32 2147483648, %v899_v4  ;;  %v909_v11 = vand.u32 2147483647, %v899_v4  ;;  %vm905_vm5 = vweird.f32 %v899_v4 }
 0x251   : > { %v912_v13 = vor.u32 1.1754944e-38, %v911_v9  ;;  %vm910_vm7 = vcmp.eq.f32.partialorder %v909_v11, 8.507059e+37 }
 0x255   : > { %v1415_v6 = vpop.eup %1414 }
 0x256   : > { %v901_v7 = vmul.f32 %v1415_v6, %v899_v4  ;;  %vm906_vm4 = vweird.f32 %v1415_v6 }
 0x257   : > { %vm907_vm6 = vmor %vm905_vm5, %vm906_vm4 }
 0x258   : > { %v902_v8 = vsub.f32 1.0, %v901_v7 }
 0x25a   : > { %v903_v10 = vmul.f32 %v1415_v6, %v902_v8 }
 0x25c   : > { %v904_v12 = vadd.f32 %v1415_v6, %v903_v10 }
 0x25e   : > { %v908_v14 = vsel %vm907_vm6, %v1415_v6, %v904_v12 }
 0x25f   : > { %v913_v15 = vsel %vm910_vm7, %v912_v13, %v908_v14 }
 0x260   : > { %v914_v16 = vmul.f32 %v1413_v55, %v913_v15 }
 0x262   : > { %v915_v17 = vpack.c.bf16 %v914_v16, %v914_v16 }
 0x264   : > { %1314 = vmatmul.msk.bf16.vlgmr.msrb.gmra.mxu3 %vm890_vm3, %v915_v17 }
 0x2e7   : > { %v929_v19 = vpop.f32.mrf.mxu3 }
 0x2e8   : > { %v934_v20 = vpack.c.bf16 %v929_v19, %v929_v19 }
 0x2ea   : > { %1331 = vmatmul.msk.bf16.vlgmr.msra.gmra.mxu3 %vm864_vm0, %v934_v20 }
 0x2ef   : > { %v931_v21 = vpop.f32.mrf.mxu3 }
 0x36d   : > { %v979_v23 = vpop.f32.mrf.mxu3 }
 0x36e   : > { %v983_v24 = vadd.f32 %v979_v23, %v933_v22 }
 0x370   : > { %984 = vst [vmem:[#allocation2] sm:$0xff] %v983_v24 }
 0x371   : > { %988 = sbr.rel (%p1332_p8) target bundleno = 1164 (0x48c), region = 80 }
 0x375   : > { %v981_v25 = vpop.f32.mrf.mxu3 }
 0x376   : > { %v990_v26 = vld [vmem:[%s1750_s15] sm:$0x1]  ;;  %v994_v30 = vunpack.c.l.bf16 %v1647_v18  ;;  %v1464_v33 = vmov 128.0  }
 0x377   : > { %v991_v27 = vunpack.c.l.bf16 %v990_v26  ;;  %v989_v28 = vld [vmem:[#allocation2] sm:$0xff]  ;;  %1418 = vrcp.f32 %v1464_v33 }
 0x378   : > { %v1416_v52 = vld [vmem:[%s1751_s14] ss:$0 sm:$0xff] }
 0x379   : > { %v992_v29 = vperm.slane %v991_v27, 0  ;;  %v1417_v54 = vld [vmem:[%s1752_s29] ss:$0 sm:$0xff] }
 0x37b   : > { %v993_v31 = vadd.f32 %v992_v29, %v989_v28 }
 0x37d   : > { %v995_v32 = vadd.f32 %v994_v30, %v993_v31  ;;  %v1419_v34 = vpop.eup %1418 }
 0x37e   : > { %v1001_v35 = vmul.f32 128.0, %v1419_v34  ;;  %vm1005_vm8 = vweird.f32 %v1419_v34 }
 0x37f   : > { %998 = vadd.xlane.f32.xlu0 %v995_v32 }
 0x380   : > { %v1002_v36 = vsub.f32 1.0, %v1001_v35 }
 0x382   : > { %v1003_v37 = vmul.f32 %v1419_v34, %v1002_v36 }
 0x384   : > { %v1004_v38 = vadd.f32 %v1419_v34, %v1003_v37 }
 0x386   : > { %v1006_v39 = vsel %vm1005_vm8, %v1419_v34, %v1004_v38 }
 0x3f2   : > { %v999_v40 = vpop.xlane.xlu0 %998 }
 0x3f3   : > { %v1007_v41 = vmul.f32 %v1006_v39, %v999_v40 }
 0x3f5   : > { %v1008_v42 = vsub.f32 %v995_v32, %v1007_v41 }
 0x3f7   : > { %v1009_v43 = vmul.f32 %v1008_v42, %v1008_v42 }
 0x3f9   : > { %1010 = vadd.xlane.f32.xlu0 %v1009_v43 }
 0x46c   : > { %v1011_v44 = vpop.xlane.xlu0 %1010 }
 0x46d   : > { %v1012_v45 = vmul.f32 %v1011_v44, %v1006_v39 }
 0x46f   : > { %v1013_v18 = vadd.f32 1e-05, %v1012_v45 }
 0x471   : > { %1420 = vrsqrt.f32 %v1013_v18  ;;  %vm1020_vm10 = vweird.f32 %v1013_v18 }
 0x477   : > { %v1421_v46 = vpop.eup %1420 }
 0x478   : > { %v1015_v47 = vmul.f32 %v1421_v46, %v1013_v18  ;;  %vm1021_vm9 = vweird.f32 %v1421_v46 }
 0x479   : > { %vm1022_vm11 = vmor %vm1020_vm10, %vm1021_vm9 }
 0x47a   : > { %v1016_v48 = vmul.f32 %v1421_v46, %v1015_v47 }
 0x47c   : > { %v1017_v49 = vmul.f32 0.5, %v1016_v48 }
 0x47e   : > { %v1018_v50 = vsub.f32 1.5, %v1017_v49 }
 0x480   : > { %v1019_v51 = vmul.f32 %v1421_v46, %v1018_v50 }
 0x482   : > { %v1023_v53 = vsel %vm1022_vm11, %v1421_v46, %v1019_v51 }
 0x483   : > { %v1024_v55 = vmul.f32 %v1023_v53, %v1008_v42 }
 0x485   : > { %v1028_v56 = vmul.f32 %v1416_v52, %v1024_v55 }
 0x487   : > { %v1032_v57 = vadd.f32 %v1417_v54, %v1028_v56 }
 0x489   : > { %v1033_v58 = vpack.c.bf16 %v1032_v57, %v1032_v57 }
 0x48b   : > { %1034 = vst [vmem:[%s1621_s0] sm:$0xf] %v1033_v58 }
 0x48c PF: > { %s1753_s10 = sld [smem:[#allocation5_spill]] }
 0x48d   : > { %s1754_s25 = sld [smem:[#allocation3_spill]] }
 0x48e   : > { %s1755_s26 = sld [smem:[#allocation4_spill]] }
 0x48f   : > { %s1756_s27 = sld [smem:[#allocation6_spill]] }
 0x490   : > { %s1757_s28 = sld [smem:[#allocation7_spill]] }
 0x492   : > { %s23_s29 = sadd.s32 1, %s1753_s10  }
 0x493   : > { %p20_p9 = scmp.ge.s32.totalorder %s23_s29, 6  }
 0x495   :  { %22 = sbr.rel (!%p20_p9) target bundleno = 8 (0x8), region = 137 }

</bundles_post_ra>
